<compile_context>
chip_gen: v7x
topology: tpu7x:2x2x1
jax: 0.10.0
libtpu: 0.0.40
codegen_flags: <defaults>
</compile_context>

<pallas_src>
import jax
import jax.numpy as jnp
from jax.experimental import pallas as pl
from jax.experimental.pallas import tpu as pltpu

# ---------------- small synthetic BERT config ----------------
VOCAB = 128
HIDDEN = 128
SEQ = 8
N_LAYERS = 2
N_HEADS = 4
HEAD_DIM = HIDDEN // N_HEADS
INTERMEDIATE = 4 * HIDDEN
TYPE_VOCAB = 2
MAX_POS = 32
LN_EPS = 1e-12


def _layer_norm(x, gamma, beta):
    # two-pass statistics (numerically safe; negligible cost at these shapes)
    mu = jnp.mean(x, axis=-1, keepdims=True)
    d = x - mu
    var = jnp.mean(d * d, axis=-1, keepdims=True)
    return d * jax.lax.rsqrt(var + LN_EPS) * gamma + beta


# ---------------- fused kernel: embed-LN + all encoder layers + pooler ----------------
def fused_bert_kernel(emb_ref, embln_ref,
                      wqkv_ref, bqkv_ref, wo_ref, w1_ref, b1_ref, w2_ref, vec_ref,
                      pw_ref, pb_ref,
                      out_ref):
    # --- embedding LayerNorm ---
    x0 = _layer_norm(emb_ref[...], embln_ref[0:1, :], embln_ref[1:2, :])   # (S, H) f32

    def layer_body(l, x):
        xb = x.astype(jnp.bfloat16)

        # --- self attention ---
        # single lane-dense QKV projection: (S,H) @ (H,3H) -> (S,3H), f32 accumulation.
        # The Q columns of Wqkv / bqkv carry the 1/sqrt(HEAD_DIM) scale (folded host-side).
        qkv = jnp.dot(xb, wqkv_ref[l],
                      preferred_element_type=jnp.float32) + bqkv_ref[l]    # (S, 3H)

        # split into heads via static lane slices + leading-axis stack (no transposes)
        def heads(off):
            return jnp.stack(
                [qkv[:, off + h * HEAD_DIM: off + (h + 1) * HEAD_DIM]
                 for h in range(N_HEADS)], axis=0)                         # (Hn, S, D)

        q = heads(0)
        k = heads(HIDDEN)
        v = heads(2 * HIDDEN)

        s = jnp.einsum('hqd,hkd->hqk', q, k,
                       preferred_element_type=jnp.float32)                 # (Hn, S, S)
        s = s - jnp.max(s, axis=-1, keepdims=True)
        p = jnp.exp(s)
        # softmax denominator on the EUP (approx reciprocal) instead of a VALU divide
        p = p * pl.reciprocal(jnp.sum(p, axis=-1, keepdims=True), approx=True)
        # TODO(synk): no padding mask — valid only for the batch=1 / no-padding case of the module.

        ctx = jnp.einsum('hqk,hkd->hqd', p.astype(jnp.bfloat16), v.astype(jnp.bfloat16),
                         preferred_element_type=jnp.float32)               # (Hn, S, D)

        # merge heads onto the lane axis -> (S, H); single K=128 output projection
        ctx2 = jnp.concatenate([ctx[h] for h in range(N_HEADS)], axis=-1)  # (S, H)
        vec = vec_ref[l]                                                   # (6, H) f32
        attn = jnp.dot(ctx2.astype(jnp.bfloat16), wo_ref[l],
                       preferred_element_type=jnp.float32) + vec[0:1, :]   # + bo

        h1 = _layer_norm(x + attn, vec[2:3, :], vec[3:4, :])               # LN1

        # --- feed-forward ---
        ff = jnp.dot(h1.astype(jnp.bfloat16), w1_ref[l],
                     preferred_element_type=jnp.float32) + b1_ref[l]
        ff = jax.nn.gelu(ff, approximate=True)  # TODO(synk): HF BERT uses exact erf-GELU; tanh approx used for TPU EUP
        ff = jnp.dot(ff.astype(jnp.bfloat16), w2_ref[l],
                     preferred_element_type=jnp.float32) + vec[1:2, :]     # + b2

        return _layer_norm(h1 + ff, vec[4:5, :], vec[5:6, :])              # LN2

    x = jax.lax.fori_loop(0, N_LAYERS, layer_body, x0, unroll=True)

    # --- pooler ---
    cls = x[0:1, :]                                                        # (1, H) CLS token
    z = jnp.dot(cls.astype(jnp.bfloat16), pw_ref[...],
                preferred_element_type=jnp.float32) + pb_ref[...]
    out_ref[...] = jnp.tanh(z)


# ---------------- advisory cost estimate (static ints) ----------------
_MM_FLOPS_PER_LAYER = (2 * SEQ * HIDDEN * (3 * HIDDEN)            # fused QKV
                       + 2 * 2 * N_HEADS * SEQ * SEQ * HEAD_DIM   # scores + context
                       + 2 * SEQ * HIDDEN * HIDDEN                # output projection
                       + 2 * 2 * SEQ * HIDDEN * INTERMEDIATE)     # FFN
_TOTAL_FLOPS = N_LAYERS * _MM_FLOPS_PER_LAYER + 2 * HIDDEN * HIDDEN
_TRANSCENDENTALS = (N_LAYERS * (N_HEADS * SEQ * SEQ + SEQ * INTERMEDIATE
                                + N_HEADS * SEQ + 2 * SEQ)
                    + HIDDEN + SEQ)
_BYTES_ACCESSED = (
    N_LAYERS * (HIDDEN * 3 * HIDDEN + HIDDEN * HIDDEN + 2 * HIDDEN * INTERMEDIATE) * 2  # bf16 weights
    + HIDDEN * HIDDEN * 2                                                               # pooler W (bf16)
    + N_LAYERS * (3 * HIDDEN + INTERMEDIATE + 6 * HIDDEN) * 4                           # f32 biases / LN params
    + (SEQ * HIDDEN + 2 * HIDDEN + HIDDEN + HIDDEN) * 4)                                # emb, emb_ln, pooler_b, out


# ---------------- single fused pallas_call (no grid: everything fits VMEM trivially) ----------------
def run_fused_bert(x_emb, emb_ln, p):
    vmem = pltpu.MemorySpace.VMEM
    return pl.pallas_call(
        fused_bert_kernel,
        out_shape=jax.ShapeDtypeStruct((1, HIDDEN), jnp.float32),
        in_specs=[pl.BlockSpec(memory_space=vmem)] * 11,
        out_specs=pl.BlockSpec(memory_space=vmem),
        compiler_params=pltpu.CompilerParams(
            vmem_limit_bytes=32 * 1024 * 1024,     # explicit budget (safe on v5e/v6e/v7x)
        ),
        cost_estimate=pl.CostEstimate(
            flops=_TOTAL_FLOPS,
            transcendentals=_TRANSCENDENTALS,
            bytes_accessed=_BYTES_ACCESSED,
        ),
    )(x_emb, emb_ln,
      p["wqkv"], p["bqkv"], p["wo"], p["w1"], p["b1"], p["w2"], p["vec6"],
      p["pooler_w"], p["pooler_b"])
    # TODO(synk): at BERT-base scale (H=768, I=3072, 12 layers) the per-layer weights no
    # longer all fit in VMEM — reintroduce a layer grid (and INTERMEDIATE-split W1/W2
    # blocks for v7x's 64 MiB VMEM) with double-buffered BlockSpecs.


# ---------------- parameter init + packing (deterministic, synthetic) ----------------
def init_params(key):
    def nrm(k, shape, scale=0.02):
        return (scale * jax.random.normal(k, shape)).astype(jnp.float32)

    keys = jax.random.split(key, 4 + N_LAYERS)
    params = {
        "word_emb": nrm(keys[0], (VOCAB, HIDDEN)),
        "pos_emb": nrm(keys[1], (MAX_POS, HIDDEN)),
        "type_emb": nrm(keys[2], (TYPE_VOCAB, HIDDEN)),
        "emb_ln_g": jnp.ones((1, HIDDEN), jnp.float32),
        "emb_ln_b": jnp.zeros((1, HIDDEN), jnp.float32),
        "pooler_w": nrm(keys[3], (HIDDEN, HIDDEN)).astype(jnp.bfloat16),
        "pooler_b": jnp.zeros((1, HIDDEN), jnp.float32),
    }

    att_scale = 1.0 / (HEAD_DIM ** 0.5)
    wqkv_l, bqkv_l, wo_l, w1_l, b1_l, w2_l, vec_l = [], [], [], [], [], [], []
    for li in range(N_LAYERS):
        lk = jax.random.split(keys[4 + li], 6)
        # (in, out) orientation; real PyTorch nn.Linear (out, in) weights must be transposed.
        wq, wk, wv, wo = (nrm(lk[i], (HIDDEN, HIDDEN)) for i in range(4))
        w1 = nrm(lk[4], (HIDDEN, INTERMEDIATE))
        w2 = nrm(lk[5], (INTERMEDIATE, HIDDEN))
        bq = bk = bv = bo = b2 = jnp.zeros((HIDDEN,), jnp.float32)
        b1 = jnp.zeros((INTERMEDIATE,), jnp.float32)
        ln1_g = ln2_g = jnp.ones((HIDDEN,), jnp.float32)
        ln1_b = ln2_b = jnp.zeros((HIDDEN,), jnp.float32)

        # fused lane-dense QKV weight, attention scale folded into the Q columns
        wqkv_l.append(jnp.concatenate([wq * att_scale, wk, wv], axis=1))          # (H, 3H)
        bqkv_l.append(jnp.concatenate([bq * att_scale, bk, bv]).reshape(1, 3 * HIDDEN))
        wo_l.append(wo)                                                           # (H, H)
        w1_l.append(w1)
        b1_l.append(b1.reshape(1, INTERMEDIATE))
        w2_l.append(w2)
        vec_l.append(jnp.stack([bo, b2, ln1_g, ln1_b, ln2_g, ln2_b], axis=0))     # (6, H)

    params["wqkv"] = jnp.stack(wqkv_l).astype(jnp.bfloat16)   # (L, H, 3H)
    params["bqkv"] = jnp.stack(bqkv_l)                        # (L, 1, 3H) f32 (Q part pre-scaled)
    params["wo"] = jnp.stack(wo_l).astype(jnp.bfloat16)       # (L, H, H)
    params["w1"] = jnp.stack(w1_l).astype(jnp.bfloat16)       # (L, H, I)
    params["b1"] = jnp.stack(b1_l)                            # (L, 1, I)  f32
    params["w2"] = jnp.stack(w2_l).astype(jnp.bfloat16)       # (L, I, H)
    params["vec6"] = jnp.stack(vec_l)                         # (L, 6, H)  f32
    return params


# ---------------- full forward (equivalent of Bert.forward -> pooler_output.reshape(-1)) ----------------
def bert_forward(params, token_ids):
    # token_ids: (1, SEQ) int32 — the "tokenized text" (batch of 1, as in the module)
    ids = token_ids[0]                                                  # (S,)
    # embedding gathers: plain-JAX glue
    x_emb = (jnp.take(params["word_emb"], ids, axis=0)
             + params["pos_emb"][:SEQ]
             + params["type_emb"][0][None, :])                          # (S, H) f32
    emb_ln = jnp.concatenate([params["emb_ln_g"], params["emb_ln_b"]], axis=0)  # (2, H)

    pooled = run_fused_bert(x_emb, emb_ln, params)                      # (1, H)
    return pooled.reshape(-1)                                           # (H,)


if __name__ == "__main__":
    key = jax.random.PRNGKey(0)
    pkey, ikey = jax.random.split(key)
    params = init_params(pkey)
    token_ids = jax.random.randint(ikey, (1, SEQ), 0, VOCAB, dtype=jnp.int32)

    fwd = jax.jit(bert_forward)
    out = fwd(params, token_ids)
    jax.block_until_ready(out)
    assert out.shape == (HIDDEN,) and out.dtype == jnp.float32
    assert bool(jnp.all(jnp.isfinite(out)))
    print("KERNEL_OK")
</pallas_src>

<mosaic_0001>
module attributes {stable_mosaic.version = 11 : i64} {
  func.func @fused_bert_kernel(%arg0: memref<8x128xf32, #tpu.memory_space<vmem>>, %arg1: memref<2x128xf32, #tpu.memory_space<vmem>>, %arg2: memref<2x128x384xbf16, #tpu.memory_space<vmem>>, %arg3: memref<2x1x384xf32, #tpu.memory_space<vmem>>, %arg4: memref<2x128x128xbf16, #tpu.memory_space<vmem>>, %arg5: memref<2x128x512xbf16, #tpu.memory_space<vmem>>, %arg6: memref<2x1x512xf32, #tpu.memory_space<vmem>>, %arg7: memref<2x512x128xbf16, #tpu.memory_space<vmem>>, %arg8: memref<2x6x128xf32, #tpu.memory_space<vmem>>, %arg9: memref<128x128xbf16, #tpu.memory_space<vmem>>, %arg10: memref<1x128xf32, #tpu.memory_space<vmem>>, %arg11: memref<1x128xf32, #tpu.memory_space<vmem>>) attributes {dimension_semantics = [], scalar_prefetch = 0 : i64, scratch_operands = 0 : i64, tpu.core_type = #tpu.core_type<tc>} {
    %c0 = arith.constant 0 : index
    %c0_0 = arith.constant 0 : index
    %0 = vector.load %arg0[%c0, %c0_0] : memref<8x128xf32, #tpu.memory_space<vmem>>, vector<8x128xf32>
    %c0_1 = arith.constant 0 : index
    %c0_2 = arith.constant 0 : index
    %1 = vector.load %arg1[%c0_1, %c0_2] : memref<2x128xf32, #tpu.memory_space<vmem>>, vector<1x128xf32>
    %c1 = arith.constant 1 : index
    %c0_3 = arith.constant 0 : index
    %2 = vector.load %arg1[%c1, %c0_3] : memref<2x128xf32, #tpu.memory_space<vmem>>, vector<1x128xf32>
    %cst = arith.constant dense<0.000000e+00> : vector<8xf32>
    %3 = vector.multi_reduction <add>, %0, %cst [1] : vector<8x128xf32> to vector<8xf32>
    %4 = vector.shape_cast %3 : vector<8xf32> to vector<8x1xf32>
    %cst_4 = arith.constant 1.280000e+02 : f32
    %5 = vector.broadcast %cst_4 : f32 to vector<8x1xf32>
    %6 = arith.divf %4, %5 : vector<8x1xf32>
    %7 = vector.broadcast %6 : vector<8x1xf32> to vector<8x128xf32>
    %8 = arith.subf %0, %7 : vector<8x128xf32>
    %9 = arith.mulf %8, %8 : vector<8x128xf32>
    %cst_5 = arith.constant dense<0.000000e+00> : vector<8xf32>
    %10 = vector.multi_reduction <add>, %9, %cst_5 [1] : vector<8x128xf32> to vector<8xf32>
    %11 = vector.shape_cast %10 : vector<8xf32> to vector<8x1xf32>
    %cst_6 = arith.constant 1.280000e+02 : f32
    %12 = vector.broadcast %cst_6 : f32 to vector<8x1xf32>
    %13 = arith.divf %11, %12 : vector<8x1xf32>
    %cst_7 = arith.constant 9.99999996E-13 : f32
    %14 = vector.broadcast %cst_7 : f32 to vector<8x1xf32>
    %15 = arith.addf %13, %14 : vector<8x1xf32>
    %16 = math.rsqrt %15 : vector<8x1xf32>
    %17 = vector.broadcast %16 : vector<8x1xf32> to vector<8x128xf32>
    %18 = arith.mulf %8, %17 : vector<8x128xf32>
    %19 = vector.broadcast %1 : vector<1x128xf32> to vector<8x128xf32>
    %20 = arith.mulf %18, %19 : vector<8x128xf32>
    %21 = vector.broadcast %2 : vector<1x128xf32> to vector<8x128xf32>
    %22 = arith.addf %20, %21 : vector<8x128xf32>
    %c0_i32 = arith.constant 0 : i32
    %23 = arith.truncf %22 : vector<8x128xf32> to vector<8x128xbf16>
    %24 = arith.index_cast %c0_i32 : i32 to index
    %c0_8 = arith.constant 0 : index
    %c0_9 = arith.constant 0 : index
    %25 = vector.load %arg2[%24, %c0_8, %c0_9] : memref<2x128x384xbf16, #tpu.memory_space<vmem>>, vector<1x128x384xbf16>
    %26 = vector.shape_cast %25 : vector<1x128x384xbf16> to vector<128x384xbf16>
    %cst_10 = arith.constant dense<0.000000e+00> : vector<8x384xf32>
    %27 = tpu.matmul %23, %26, %cst_10 {dimension_numbers = #tpu.dot_dimension_numbers<[1], [0], [0], [1], [0, 0, 1, 1], [], []>} : vector<8x128xbf16>, vector<128x384xbf16>, vector<8x384xf32> -> vector<8x384xf32>
    %28 = arith.index_cast %c0_i32 : i32 to index
    %c0_11 = arith.constant 0 : index
    %c0_12 = arith.constant 0 : index
    %29 = vector.load %arg3[%28, %c0_11, %c0_12] : memref<2x1x384xf32, #tpu.memory_space<vmem>>, vector<1x1x384xf32>
    %30 = vector.shape_cast %29 : vector<1x1x384xf32> to vector<1x384xf32>
    %31 = vector.broadcast %30 : vector<1x384xf32> to vector<8x384xf32>
    %32 = arith.addf %27, %31 : vector<8x384xf32>
    %33 = vector.extract_strided_slice %32 {offsets = [0, 0], sizes = [8, 32], strides = [1, 1]} : vector<8x384xf32> to vector<8x32xf32>
    %34 = vector.extract_strided_slice %32 {offsets = [0, 32], sizes = [8, 32], strides = [1, 1]} : vector<8x384xf32> to vector<8x32xf32>
    %35 = vector.extract_strided_slice %32 {offsets = [0, 64], sizes = [8, 32], strides = [1, 1]} : vector<8x384xf32> to vector<8x32xf32>
    %36 = vector.extract_strided_slice %32 {offsets = [0, 96], sizes = [8, 32], strides = [1, 1]} : vector<8x384xf32> to vector<8x32xf32>
    %37 = vector.shape_cast %33 : vector<8x32xf32> to vector<1x8x32xf32>
    %38 = vector.shape_cast %34 : vector<8x32xf32> to vector<1x8x32xf32>
    %39 = vector.shape_cast %35 : vector<8x32xf32> to vector<1x8x32xf32>
    %40 = vector.shape_cast %36 : vector<8x32xf32> to vector<1x8x32xf32>
    %41 = tpu.concatenate %37, %38, %39, %40 in 0 : vector<1x8x32xf32>, vector<1x8x32xf32>, vector<1x8x32xf32>, vector<1x8x32xf32> -> vector<4x8x32xf32>
    %42 = vector.extract_strided_slice %32 {offsets = [0, 128], sizes = [8, 32], strides = [1, 1]} : vector<8x384xf32> to vector<8x32xf32>
    %43 = vector.extract_strided_slice %32 {offsets = [0, 160], sizes = [8, 32], strides = [1, 1]} : vector<8x384xf32> to vector<8x32xf32>
    %44 = vector.extract_strided_slice %32 {offsets = [0, 192], sizes = [8, 32], strides = [1, 1]} : vector<8x384xf32> to vector<8x32xf32>
    %45 = vector.extract_strided_slice %32 {offsets = [0, 224], sizes = [8, 32], strides = [1, 1]} : vector<8x384xf32> to vector<8x32xf32>
    %46 = vector.shape_cast %42 : vector<8x32xf32> to vector<1x8x32xf32>
    %47 = vector.shape_cast %43 : vector<8x32xf32> to vector<1x8x32xf32>
    %48 = vector.shape_cast %44 : vector<8x32xf32> to vector<1x8x32xf32>
    %49 = vector.shape_cast %45 : vector<8x32xf32> to vector<1x8x32xf32>
    %50 = tpu.concatenate %46, %47, %48, %49 in 0 : vector<1x8x32xf32>, vector<1x8x32xf32>, vector<1x8x32xf32>, vector<1x8x32xf32> -> vector<4x8x32xf32>
    %51 = vector.extract_strided_slice %32 {offsets = [0, 256], sizes = [8, 32], strides = [1, 1]} : vector<8x384xf32> to vector<8x32xf32>
    %52 = vector.extract_strided_slice %32 {offsets = [0, 288], sizes = [8, 32], strides = [1, 1]} : vector<8x384xf32> to vector<8x32xf32>
    %53 = vector.extract_strided_slice %32 {offsets = [0, 320], sizes = [8, 32], strides = [1, 1]} : vector<8x384xf32> to vector<8x32xf32>
    %54 = vector.extract_strided_slice %32 {offsets = [0, 352], sizes = [8, 32], strides = [1, 1]} : vector<8x384xf32> to vector<8x32xf32>
    %55 = vector.shape_cast %51 : vector<8x32xf32> to vector<1x8x32xf32>
    %56 = vector.shape_cast %52 : vector<8x32xf32> to vector<1x8x32xf32>
    %57 = vector.shape_cast %53 : vector<8x32xf32> to vector<1x8x32xf32>
    %58 = vector.shape_cast %54 : vector<8x32xf32> to vector<1x8x32xf32>
    %59 = tpu.concatenate %55, %56, %57, %58 in 0 : vector<1x8x32xf32>, vector<1x8x32xf32>, vector<1x8x32xf32>, vector<1x8x32xf32> -> vector<4x8x32xf32>
    "tpu.trace_start"() <{level = 10 : i32, message = "hqd,hkd->hqk"}> : () -> ()
    %cst_13 = arith.constant dense<0.000000e+00> : vector<4x8x8xf32>
    %60 = tpu.matmul %41, %50, %cst_13 {dimension_numbers = #tpu.dot_dimension_numbers<[2], [2], [1], [1], [0, 0, 0, 1, 1, 1], [0], [0]>} : vector<4x8x32xf32>, vector<4x8x32xf32>, vector<4x8x8xf32> -> vector<4x8x8xf32>
    "tpu.trace_stop"() : () -> ()
    %cst_14 = arith.constant dense<0xFF800000> : vector<4x8xf32>
    %61 = vector.multi_reduction <maximumf>, %60, %cst_14 [2] : vector<4x8x8xf32> to vector<4x8xf32>
    %62 = vector.shape_cast %61 : vector<4x8xf32> to vector<4x8x1xf32>
    %63 = vector.broadcast %62 : vector<4x8x1xf32> to vector<4x8x8xf32>
    %64 = arith.subf %60, %63 : vector<4x8x8xf32>
    %65 = math.exp %64 : vector<4x8x8xf32>
    %cst_15 = arith.constant dense<0.000000e+00> : vector<4x8xf32>
    %66 = vector.multi_reduction <add>, %65, %cst_15 [2] : vector<4x8x8xf32> to vector<4x8xf32>
    %67 = vector.shape_cast %66 : vector<4x8xf32> to vector<4x8x1xf32>
    %68 = tpu.reciprocal %67 {approx = true} : vector<4x8x1xf32> -> vector<4x8x1xf32>
    %69 = vector.broadcast %68 : vector<4x8x1xf32> to vector<4x8x8xf32>
    %70 = arith.mulf %65, %69 : vector<4x8x8xf32>
    %71 = arith.truncf %70 : vector<4x8x8xf32> to vector<4x8x8xbf16>
    %72 = arith.truncf %59 : vector<4x8x32xf32> to vector<4x8x32xbf16>
    "tpu.trace_start"() <{level = 10 : i32, message = "hqk,hkd->hqd"}> : () -> ()
    %cst_16 = arith.constant dense<0.000000e+00> : vector<4x8x32xf32>
    %73 = tpu.matmul %71, %72, %cst_16 {dimension_numbers = #tpu.dot_dimension_numbers<[2], [1], [1], [2], [0, 0, 0, 1, 1, 2], [0], [0]>} : vector<4x8x8xbf16>, vector<4x8x32xbf16>, vector<4x8x32xf32> -> vector<4x8x32xf32>
    "tpu.trace_stop"() : () -> ()
    %74 = vector.extract_strided_slice %73 {offsets = [0, 0, 0], sizes = [1, 8, 32], strides = [1, 1, 1]} : vector<4x8x32xf32> to vector<1x8x32xf32>
    %75 = vector.shape_cast %74 : vector<1x8x32xf32> to vector<8x32xf32>
    %76 = vector.extract_strided_slice %73 {offsets = [1, 0, 0], sizes = [1, 8, 32], strides = [1, 1, 1]} : vector<4x8x32xf32> to vector<1x8x32xf32>
    %77 = vector.shape_cast %76 : vector<1x8x32xf32> to vector<8x32xf32>
    %78 = vector.extract_strided_slice %73 {offsets = [2, 0, 0], sizes = [1, 8, 32], strides = [1, 1, 1]} : vector<4x8x32xf32> to vector<1x8x32xf32>
    %79 = vector.shape_cast %78 : vector<1x8x32xf32> to vector<8x32xf32>
    %80 = vector.extract_strided_slice %73 {offsets = [3, 0, 0], sizes = [1, 8, 32], strides = [1, 1, 1]} : vector<4x8x32xf32> to vector<1x8x32xf32>
    %81 = vector.shape_cast %80 : vector<1x8x32xf32> to vector<8x32xf32>
    %82 = tpu.concatenate %75, %77, %79, %81 in 1 : vector<8x32xf32>, vector<8x32xf32>, vector<8x32xf32>, vector<8x32xf32> -> vector<8x128xf32>
    %83 = arith.index_cast %c0_i32 : i32 to index
    %c0_17 = arith.constant 0 : index
    %c0_18 = arith.constant 0 : index
    %84 = vector.load %arg8[%83, %c0_17, %c0_18] : memref<2x6x128xf32, #tpu.memory_space<vmem>>, vector<1x6x128xf32>
    %85 = vector.shape_cast %84 : vector<1x6x128xf32> to vector<6x128xf32>
    %86 = arith.truncf %82 : vector<8x128xf32> to vector<8x128xbf16>
    %87 = arith.index_cast %c0_i32 : i32 to index
    %c0_19 = arith.constant 0 : index
    %c0_20 = arith.constant 0 : index
    %88 = vector.load %arg4[%87, %c0_19, %c0_20] : memref<2x128x128xbf16, #tpu.memory_space<vmem>>, vector<1x128x128xbf16>
    %89 = vector.shape_cast %88 : vector<1x128x128xbf16> to vector<128x128xbf16>
    %cst_21 = arith.constant dense<0.000000e+00> : vector<8x128xf32>
    %90 = tpu.matmul %86, %89, %cst_21 {dimension_numbers = #tpu.dot_dimension_numbers<[1], [0], [0], [1], [0, 0, 1, 1], [], []>} : vector<8x128xbf16>, vector<128x128xbf16>, vector<8x128xf32> -> vector<8x128xf32>
    %91 = vector.extract_strided_slice %85 {offsets = [0, 0], sizes = [1, 128], strides = [1, 1]} : vector<6x128xf32> to vector<1x128xf32>
    %92 = vector.broadcast %91 : vector<1x128xf32> to vector<8x128xf32>
    %93 = arith.addf %90, %92 : vector<8x128xf32>
    %94 = arith.addf %22, %93 : vector<8x128xf32>
    %95 = vector.extract_strided_slice %85 {offsets = [2, 0], sizes = [1, 128], strides = [1, 1]} : vector<6x128xf32> to vector<1x128xf32>
    %96 = vector.extract_strided_slice %85 {offsets = [3, 0], sizes = [1, 128], strides = [1, 1]} : vector<6x128xf32> to vector<1x128xf32>
    %cst_22 = arith.constant dense<0.000000e+00> : vector<8xf32>
    %97 = vector.multi_reduction <add>, %94, %cst_22 [1] : vector<8x128xf32> to vector<8xf32>
    %98 = vector.shape_cast %97 : vector<8xf32> to vector<8x1xf32>
    %cst_23 = arith.constant 1.280000e+02 : f32
    %99 = vector.broadcast %cst_23 : f32 to vector<8x1xf32>
    %100 = arith.divf %98, %99 : vector<8x1xf32>
    %101 = vector.broadcast %100 : vector<8x1xf32> to vector<8x128xf32>
    %102 = arith.subf %94, %101 : vector<8x128xf32>
    %103 = arith.mulf %102, %102 : vector<8x128xf32>
    %cst_24 = arith.constant dense<0.000000e+00> : vector<8xf32>
    %104 = vector.multi_reduction <add>, %103, %cst_24 [1] : vector<8x128xf32> to vector<8xf32>
    %105 = vector.shape_cast %104 : vector<8xf32> to vector<8x1xf32>
    %cst_25 = arith.constant 1.280000e+02 : f32
    %106 = vector.broadcast %cst_25 : f32 to vector<8x1xf32>
    %107 = arith.divf %105, %106 : vector<8x1xf32>
    %cst_26 = arith.constant 9.99999996E-13 : f32
    %108 = vector.broadcast %cst_26 : f32 to vector<8x1xf32>
    %109 = arith.addf %107, %108 : vector<8x1xf32>
    %110 = math.rsqrt %109 : vector<8x1xf32>
    %111 = vector.broadcast %110 : vector<8x1xf32> to vector<8x128xf32>
    %112 = arith.mulf %102, %111 : vector<8x128xf32>
    %113 = vector.broadcast %95 : vector<1x128xf32> to vector<8x128xf32>
    %114 = arith.mulf %112, %113 : vector<8x128xf32>
    %115 = vector.broadcast %96 : vector<1x128xf32> to vector<8x128xf32>
    %116 = arith.addf %114, %115 : vector<8x128xf32>
    %117 = arith.truncf %116 : vector<8x128xf32> to vector<8x128xbf16>
    %118 = arith.index_cast %c0_i32 : i32 to index
    %c0_27 = arith.constant 0 : index
    %c0_28 = arith.constant 0 : index
    %119 = vector.load %arg5[%118, %c0_27, %c0_28] : memref<2x128x512xbf16, #tpu.memory_space<vmem>>, vector<1x128x512xbf16>
    %120 = vector.shape_cast %119 : vector<1x128x512xbf16> to vector<128x512xbf16>
    %cst_29 = arith.constant dense<0.000000e+00> : vector<8x512xf32>
    %121 = tpu.matmul %117, %120, %cst_29 {dimension_numbers = #tpu.dot_dimension_numbers<[1], [0], [0], [1], [0, 0, 1, 1], [], []>} : vector<8x128xbf16>, vector<128x512xbf16>, vector<8x512xf32> -> vector<8x512xf32>
    %122 = arith.index_cast %c0_i32 : i32 to index
    %c0_30 = arith.constant 0 : index
    %c0_31 = arith.constant 0 : index
    %123 = vector.load %arg6[%122, %c0_30, %c0_31] : memref<2x1x512xf32, #tpu.memory_space<vmem>>, vector<1x1x512xf32>
    %124 = vector.shape_cast %123 : vector<1x1x512xf32> to vector<1x512xf32>
    %125 = vector.broadcast %124 : vector<1x512xf32> to vector<8x512xf32>
    %126 = arith.addf %121, %125 : vector<8x512xf32>
    %127 = arith.mulf %126, %126 : vector<8x512xf32>
    %128 = arith.mulf %126, %127 : vector<8x512xf32>
    %cst_32 = arith.constant 4.471500e-02 : f32
    %129 = vector.broadcast %cst_32 : f32 to vector<8x512xf32>
    %130 = arith.mulf %129, %128 : vector<8x512xf32>
    %131 = arith.addf %126, %130 : vector<8x512xf32>
    %cst_33 = arith.constant 0.797884583 : f32
    %132 = vector.broadcast %cst_33 : f32 to vector<8x512xf32>
    %133 = arith.mulf %132, %131 : vector<8x512xf32>
    %134 = math.tanh %133 : vector<8x512xf32>
    %cst_34 = arith.constant 1.000000e+00 : f32
    %135 = vector.broadcast %cst_34 : f32 to vector<8x512xf32>
    %136 = arith.addf %135, %134 : vector<8x512xf32>
    %cst_35 = arith.constant 5.000000e-01 : f32
    %137 = vector.broadcast %cst_35 : f32 to vector<8x512xf32>
    %138 = arith.mulf %137, %136 : vector<8x512xf32>
    %139 = arith.mulf %126, %138 : vector<8x512xf32>
    %140 = arith.truncf %139 : vector<8x512xf32> to vector<8x512xbf16>
    %141 = arith.index_cast %c0_i32 : i32 to index
    %c0_36 = arith.constant 0 : index
    %c0_37 = arith.constant 0 : index
    %142 = vector.load %arg7[%141, %c0_36, %c0_37] : memref<2x512x128xbf16, #tpu.memory_space<vmem>>, vector<1x512x128xbf16>
    %143 = vector.shape_cast %142 : vector<1x512x128xbf16> to vector<512x128xbf16>
    %cst_38 = arith.constant dense<0.000000e+00> : vector<8x128xf32>
    %144 = tpu.matmul %140, %143, %cst_38 {dimension_numbers = #tpu.dot_dimension_numbers<[1], [0], [0], [1], [0, 0, 1, 1], [], []>} : vector<8x512xbf16>, vector<512x128xbf16>, vector<8x128xf32> -> vector<8x128xf32>
    %145 = vector.extract_strided_slice %85 {offsets = [1, 0], sizes = [1, 128], strides = [1, 1]} : vector<6x128xf32> to vector<1x128xf32>
    %146 = vector.broadcast %145 : vector<1x128xf32> to vector<8x128xf32>
    %147 = arith.addf %144, %146 : vector<8x128xf32>
    %148 = arith.addf %116, %147 : vector<8x128xf32>
    %149 = vector.extract_strided_slice %85 {offsets = [4, 0], sizes = [1, 128], strides = [1, 1]} : vector<6x128xf32> to vector<1x128xf32>
    %150 = vector.extract_strided_slice %85 {offsets = [5, 0], sizes = [1, 128], strides = [1, 1]} : vector<6x128xf32> to vector<1x128xf32>
    %cst_39 = arith.constant dense<0.000000e+00> : vector<8xf32>
    %151 = vector.multi_reduction <add>, %148, %cst_39 [1] : vector<8x128xf32> to vector<8xf32>
    %152 = vector.shape_cast %151 : vector<8xf32> to vector<8x1xf32>
    %cst_40 = arith.constant 1.280000e+02 : f32
    %153 = vector.broadcast %cst_40 : f32 to vector<8x1xf32>
    %154 = arith.divf %152, %153 : vector<8x1xf32>
    %155 = vector.broadcast %154 : vector<8x1xf32> to vector<8x128xf32>
    %156 = arith.subf %148, %155 : vector<8x128xf32>
    %157 = arith.mulf %156, %156 : vector<8x128xf32>
    %cst_41 = arith.constant dense<0.000000e+00> : vector<8xf32>
    %158 = vector.multi_reduction <add>, %157, %cst_41 [1] : vector<8x128xf32> to vector<8xf32>
    %159 = vector.shape_cast %158 : vector<8xf32> to vector<8x1xf32>
    %cst_42 = arith.constant 1.280000e+02 : f32
    %160 = vector.broadcast %cst_42 : f32 to vector<8x1xf32>
    %161 = arith.divf %159, %160 : vector<8x1xf32>
    %cst_43 = arith.constant 9.99999996E-13 : f32
    %162 = vector.broadcast %cst_43 : f32 to vector<8x1xf32>
    %163 = arith.addf %161, %162 : vector<8x1xf32>
    %164 = math.rsqrt %163 : vector<8x1xf32>
    %165 = vector.broadcast %164 : vector<8x1xf32> to vector<8x128xf32>
    %166 = arith.mulf %156, %165 : vector<8x128xf32>
    %167 = vector.broadcast %149 : vector<1x128xf32> to vector<8x128xf32>
    %168 = arith.mulf %166, %167 : vector<8x128xf32>
    %169 = vector.broadcast %150 : vector<1x128xf32> to vector<8x128xf32>
    %170 = arith.addf %168, %169 : vector<8x128xf32>
    %c1_i32 = arith.constant 1 : i32
    %171 = arith.truncf %170 : vector<8x128xf32> to vector<8x128xbf16>
    %172 = arith.index_cast %c1_i32 : i32 to index
    %c0_44 = arith.constant 0 : index
    %c0_45 = arith.constant 0 : index
    %173 = vector.load %arg2[%172, %c0_44, %c0_45] : memref<2x128x384xbf16, #tpu.memory_space<vmem>>, vector<1x128x384xbf16>
    %174 = vector.shape_cast %173 : vector<1x128x384xbf16> to vector<128x384xbf16>
    %cst_46 = arith.constant dense<0.000000e+00> : vector<8x384xf32>
    %175 = tpu.matmul %171, %174, %cst_46 {dimension_numbers = #tpu.dot_dimension_numbers<[1], [0], [0], [1], [0, 0, 1, 1], [], []>} : vector<8x128xbf16>, vector<128x384xbf16>, vector<8x384xf32> -> vector<8x384xf32>
    %176 = arith.index_cast %c1_i32 : i32 to index
    %c0_47 = arith.constant 0 : index
    %c0_48 = arith.constant 0 : index
    %177 = vector.load %arg3[%176, %c0_47, %c0_48] : memref<2x1x384xf32, #tpu.memory_space<vmem>>, vector<1x1x384xf32>
    %178 = vector.shape_cast %177 : vector<1x1x384xf32> to vector<1x384xf32>
    %179 = vector.broadcast %178 : vector<1x384xf32> to vector<8x384xf32>
    %180 = arith.addf %175, %179 : vector<8x384xf32>
    %181 = vector.extract_strided_slice %180 {offsets = [0, 0], sizes = [8, 32], strides = [1, 1]} : vector<8x384xf32> to vector<8x32xf32>
    %182 = vector.extract_strided_slice %180 {offsets = [0, 32], sizes = [8, 32], strides = [1, 1]} : vector<8x384xf32> to vector<8x32xf32>
    %183 = vector.extract_strided_slice %180 {offsets = [0, 64], sizes = [8, 32], strides = [1, 1]} : vector<8x384xf32> to vector<8x32xf32>
    %184 = vector.extract_strided_slice %180 {offsets = [0, 96], sizes = [8, 32], strides = [1, 1]} : vector<8x384xf32> to vector<8x32xf32>
    %185 = vector.shape_cast %181 : vector<8x32xf32> to vector<1x8x32xf32>
    %186 = vector.shape_cast %182 : vector<8x32xf32> to vector<1x8x32xf32>
    %187 = vector.shape_cast %183 : vector<8x32xf32> to vector<1x8x32xf32>
    %188 = vector.shape_cast %184 : vector<8x32xf32> to vector<1x8x32xf32>
    %189 = tpu.concatenate %185, %186, %187, %188 in 0 : vector<1x8x32xf32>, vector<1x8x32xf32>, vector<1x8x32xf32>, vector<1x8x32xf32> -> vector<4x8x32xf32>
    %190 = vector.extract_strided_slice %180 {offsets = [0, 128], sizes = [8, 32], strides = [1, 1]} : vector<8x384xf32> to vector<8x32xf32>
    %191 = vector.extract_strided_slice %180 {offsets = [0, 160], sizes = [8, 32], strides = [1, 1]} : vector<8x384xf32> to vector<8x32xf32>
    %192 = vector.extract_strided_slice %180 {offsets = [0, 192], sizes = [8, 32], strides = [1, 1]} : vector<8x384xf32> to vector<8x32xf32>
    %193 = vector.extract_strided_slice %180 {offsets = [0, 224], sizes = [8, 32], strides = [1, 1]} : vector<8x384xf32> to vector<8x32xf32>
    %194 = vector.shape_cast %190 : vector<8x32xf32> to vector<1x8x32xf32>
    %195 = vector.shape_cast %191 : vector<8x32xf32> to vector<1x8x32xf32>
    %196 = vector.shape_cast %192 : vector<8x32xf32> to vector<1x8x32xf32>
    %197 = vector.shape_cast %193 : vector<8x32xf32> to vector<1x8x32xf32>
    %198 = tpu.concatenate %194, %195, %196, %197 in 0 : vector<1x8x32xf32>, vector<1x8x32xf32>, vector<1x8x32xf32>, vector<1x8x32xf32> -> vector<4x8x32xf32>
    %199 = vector.extract_strided_slice %180 {offsets = [0, 256], sizes = [8, 32], strides = [1, 1]} : vector<8x384xf32> to vector<8x32xf32>
    %200 = vector.extract_strided_slice %180 {offsets = [0, 288], sizes = [8, 32], strides = [1, 1]} : vector<8x384xf32> to vector<8x32xf32>
    %201 = vector.extract_strided_slice %180 {offsets = [0, 320], sizes = [8, 32], strides = [1, 1]} : vector<8x384xf32> to vector<8x32xf32>
    %202 = vector.extract_strided_slice %180 {offsets = [0, 352], sizes = [8, 32], strides = [1, 1]} : vector<8x384xf32> to vector<8x32xf32>
    %203 = vector.shape_cast %199 : vector<8x32xf32> to vector<1x8x32xf32>
    %204 = vector.shape_cast %200 : vector<8x32xf32> to vector<1x8x32xf32>
    %205 = vector.shape_cast %201 : vector<8x32xf32> to vector<1x8x32xf32>
    %206 = vector.shape_cast %202 : vector<8x32xf32> to vector<1x8x32xf32>
    %207 = tpu.concatenate %203, %204, %205, %206 in 0 : vector<1x8x32xf32>, vector<1x8x32xf32>, vector<1x8x32xf32>, vector<1x8x32xf32> -> vector<4x8x32xf32>
    "tpu.trace_start"() <{level = 10 : i32, message = "hqd,hkd->hqk"}> : () -> ()
    %cst_49 = arith.constant dense<0.000000e+00> : vector<4x8x8xf32>
    %208 = tpu.matmul %189, %198, %cst_49 {dimension_numbers = #tpu.dot_dimension_numbers<[2], [2], [1], [1], [0, 0, 0, 1, 1, 1], [0], [0]>} : vector<4x8x32xf32>, vector<4x8x32xf32>, vector<4x8x8xf32> -> vector<4x8x8xf32>
    "tpu.trace_stop"() : () -> ()
    %cst_50 = arith.constant dense<0xFF800000> : vector<4x8xf32>
    %209 = vector.multi_reduction <maximumf>, %208, %cst_50 [2] : vector<4x8x8xf32> to vector<4x8xf32>
    %210 = vector.shape_cast %209 : vector<4x8xf32> to vector<4x8x1xf32>
    %211 = vector.broadcast %210 : vector<4x8x1xf32> to vector<4x8x8xf32>
    %212 = arith.subf %208, %211 : vector<4x8x8xf32>
    %213 = math.exp %212 : vector<4x8x8xf32>
    %cst_51 = arith.constant dense<0.000000e+00> : vector<4x8xf32>
    %214 = vector.multi_reduction <add>, %213, %cst_51 [2] : vector<4x8x8xf32> to vector<4x8xf32>
    %215 = vector.shape_cast %214 : vector<4x8xf32> to vector<4x8x1xf32>
    %216 = tpu.reciprocal %215 {approx = true} : vector<4x8x1xf32> -> vector<4x8x1xf32>
    %217 = vector.broadcast %216 : vector<4x8x1xf32> to vector<4x8x8xf32>
    %218 = arith.mulf %213, %217 : vector<4x8x8xf32>
    %219 = arith.truncf %218 : vector<4x8x8xf32> to vector<4x8x8xbf16>
    %220 = arith.truncf %207 : vector<4x8x32xf32> to vector<4x8x32xbf16>
    "tpu.trace_start"() <{level = 10 : i32, message = "hqk,hkd->hqd"}> : () -> ()
    %cst_52 = arith.constant dense<0.000000e+00> : vector<4x8x32xf32>
    %221 = tpu.matmul %219, %220, %cst_52 {dimension_numbers = #tpu.dot_dimension_numbers<[2], [1], [1], [2], [0, 0, 0, 1, 1, 2], [0], [0]>} : vector<4x8x8xbf16>, vector<4x8x32xbf16>, vector<4x8x32xf32> -> vector<4x8x32xf32>
    "tpu.trace_stop"() : () -> ()
    %222 = vector.extract_strided_slice %221 {offsets = [0, 0, 0], sizes = [1, 8, 32], strides = [1, 1, 1]} : vector<4x8x32xf32> to vector<1x8x32xf32>
    %223 = vector.shape_cast %222 : vector<1x8x32xf32> to vector<8x32xf32>
    %224 = vector.extract_strided_slice %221 {offsets = [1, 0, 0], sizes = [1, 8, 32], strides = [1, 1, 1]} : vector<4x8x32xf32> to vector<1x8x32xf32>
    %225 = vector.shape_cast %224 : vector<1x8x32xf32> to vector<8x32xf32>
    %226 = vector.extract_strided_slice %221 {offsets = [2, 0, 0], sizes = [1, 8, 32], strides = [1, 1, 1]} : vector<4x8x32xf32> to vector<1x8x32xf32>
    %227 = vector.shape_cast %226 : vector<1x8x32xf32> to vector<8x32xf32>
    %228 = vector.extract_strided_slice %221 {offsets = [3, 0, 0], sizes = [1, 8, 32], strides = [1, 1, 1]} : vector<4x8x32xf32> to vector<1x8x32xf32>
    %229 = vector.shape_cast %228 : vector<1x8x32xf32> to vector<8x32xf32>
    %230 = tpu.concatenate %223, %225, %227, %229 in 1 : vector<8x32xf32>, vector<8x32xf32>, vector<8x32xf32>, vector<8x32xf32> -> vector<8x128xf32>
    %231 = arith.index_cast %c1_i32 : i32 to index
    %c0_53 = arith.constant 0 : index
    %c0_54 = arith.constant 0 : index
    %232 = vector.load %arg8[%231, %c0_53, %c0_54] : memref<2x6x128xf32, #tpu.memory_space<vmem>>, vector<1x6x128xf32>
    %233 = vector.shape_cast %232 : vector<1x6x128xf32> to vector<6x128xf32>
    %234 = arith.truncf %230 : vector<8x128xf32> to vector<8x128xbf16>
    %235 = arith.index_cast %c1_i32 : i32 to index
    %c0_55 = arith.constant 0 : index
    %c0_56 = arith.constant 0 : index
    %236 = vector.load %arg4[%235, %c0_55, %c0_56] : memref<2x128x128xbf16, #tpu.memory_space<vmem>>, vector<1x128x128xbf16>
    %237 = vector.shape_cast %236 : vector<1x128x128xbf16> to vector<128x128xbf16>
    %cst_57 = arith.constant dense<0.000000e+00> : vector<8x128xf32>
    %238 = tpu.matmul %234, %237, %cst_57 {dimension_numbers = #tpu.dot_dimension_numbers<[1], [0], [0], [1], [0, 0, 1, 1], [], []>} : vector<8x128xbf16>, vector<128x128xbf16>, vector<8x128xf32> -> vector<8x128xf32>
    %239 = vector.extract_strided_slice %233 {offsets = [0, 0], sizes = [1, 128], strides = [1, 1]} : vector<6x128xf32> to vector<1x128xf32>
    %240 = vector.broadcast %239 : vector<1x128xf32> to vector<8x128xf32>
    %241 = arith.addf %238, %240 : vector<8x128xf32>
    %242 = arith.addf %170, %241 : vector<8x128xf32>
    %243 = vector.extract_strided_slice %233 {offsets = [2, 0], sizes = [1, 128], strides = [1, 1]} : vector<6x128xf32> to vector<1x128xf32>
    %244 = vector.extract_strided_slice %233 {offsets = [3, 0], sizes = [1, 128], strides = [1, 1]} : vector<6x128xf32> to vector<1x128xf32>
    %cst_58 = arith.constant dense<0.000000e+00> : vector<8xf32>
    %245 = vector.multi_reduction <add>, %242, %cst_58 [1] : vector<8x128xf32> to vector<8xf32>
    %246 = vector.shape_cast %245 : vector<8xf32> to vector<8x1xf32>
    %cst_59 = arith.constant 1.280000e+02 : f32
    %247 = vector.broadcast %cst_59 : f32 to vector<8x1xf32>
    %248 = arith.divf %246, %247 : vector<8x1xf32>
    %249 = vector.broadcast %248 : vector<8x1xf32> to vector<8x128xf32>
    %250 = arith.subf %242, %249 : vector<8x128xf32>
    %251 = arith.mulf %250, %250 : vector<8x128xf32>
    %cst_60 = arith.constant dense<0.000000e+00> : vector<8xf32>
    %252 = vector.multi_reduction <add>, %251, %cst_60 [1] : vector<8x128xf32> to vector<8xf32>
    %253 = vector.shape_cast %252 : vector<8xf32> to vector<8x1xf32>
    %cst_61 = arith.constant 1.280000e+02 : f32
    %254 = vector.broadcast %cst_61 : f32 to vector<8x1xf32>
    %255 = arith.divf %253, %254 : vector<8x1xf32>
    %cst_62 = arith.constant 9.99999996E-13 : f32
    %256 = vector.broadcast %cst_62 : f32 to vector<8x1xf32>
    %257 = arith.addf %255, %256 : vector<8x1xf32>
    %258 = math.rsqrt %257 : vector<8x1xf32>
    %259 = vector.broadcast %258 : vector<8x1xf32> to vector<8x128xf32>
    %260 = arith.mulf %250, %259 : vector<8x128xf32>
    %261 = vector.broadcast %243 : vector<1x128xf32> to vector<8x128xf32>
    %262 = arith.mulf %260, %261 : vector<8x128xf32>
    %263 = vector.broadcast %244 : vector<1x128xf32> to vector<8x128xf32>
    %264 = arith.addf %262, %263 : vector<8x128xf32>
    %265 = arith.truncf %264 : vector<8x128xf32> to vector<8x128xbf16>
    %266 = arith.index_cast %c1_i32 : i32 to index
    %c0_63 = arith.constant 0 : index
    %c0_64 = arith.constant 0 : index
    %267 = vector.load %arg5[%266, %c0_63, %c0_64] : memref<2x128x512xbf16, #tpu.memory_space<vmem>>, vector<1x128x512xbf16>
    %268 = vector.shape_cast %267 : vector<1x128x512xbf16> to vector<128x512xbf16>
    %cst_65 = arith.constant dense<0.000000e+00> : vector<8x512xf32>
    %269 = tpu.matmul %265, %268, %cst_65 {dimension_numbers = #tpu.dot_dimension_numbers<[1], [0], [0], [1], [0, 0, 1, 1], [], []>} : vector<8x128xbf16>, vector<128x512xbf16>, vector<8x512xf32> -> vector<8x512xf32>
    %270 = arith.index_cast %c1_i32 : i32 to index
    %c0_66 = arith.constant 0 : index
    %c0_67 = arith.constant 0 : index
    %271 = vector.load %arg6[%270, %c0_66, %c0_67] : memref<2x1x512xf32, #tpu.memory_space<vmem>>, vector<1x1x512xf32>
    %272 = vector.shape_cast %271 : vector<1x1x512xf32> to vector<1x512xf32>
    %273 = vector.broadcast %272 : vector<1x512xf32> to vector<8x512xf32>
    %274 = arith.addf %269, %273 : vector<8x512xf32>
    %275 = arith.mulf %274, %274 : vector<8x512xf32>
    %276 = arith.mulf %274, %275 : vector<8x512xf32>
    %cst_68 = arith.constant 4.471500e-02 : f32
    %277 = vector.broadcast %cst_68 : f32 to vector<8x512xf32>
    %278 = arith.mulf %277, %276 : vector<8x512xf32>
    %279 = arith.addf %274, %278 : vector<8x512xf32>
    %cst_69 = arith.constant 0.797884583 : f32
    %280 = vector.broadcast %cst_69 : f32 to vector<8x512xf32>
    %281 = arith.mulf %280, %279 : vector<8x512xf32>
    %282 = math.tanh %281 : vector<8x512xf32>
    %cst_70 = arith.constant 1.000000e+00 : f32
    %283 = vector.broadcast %cst_70 : f32 to vector<8x512xf32>
    %284 = arith.addf %283, %282 : vector<8x512xf32>
    %cst_71 = arith.constant 5.000000e-01 : f32
    %285 = vector.broadcast %cst_71 : f32 to vector<8x512xf32>
    %286 = arith.mulf %285, %284 : vector<8x512xf32>
    %287 = arith.mulf %274, %286 : vector<8x512xf32>
    %288 = arith.truncf %287 : vector<8x512xf32> to vector<8x512xbf16>
    %289 = arith.index_cast %c1_i32 : i32 to index
    %c0_72 = arith.constant 0 : index
    %c0_73 = arith.constant 0 : index
    %290 = vector.load %arg7[%289, %c0_72, %c0_73] : memref<2x512x128xbf16, #tpu.memory_space<vmem>>, vector<1x512x128xbf16>
    %291 = vector.shape_cast %290 : vector<1x512x128xbf16> to vector<512x128xbf16>
    %cst_74 = arith.constant dense<0.000000e+00> : vector<8x128xf32>
    %292 = tpu.matmul %288, %291, %cst_74 {dimension_numbers = #tpu.dot_dimension_numbers<[1], [0], [0], [1], [0, 0, 1, 1], [], []>} : vector<8x512xbf16>, vector<512x128xbf16>, vector<8x128xf32> -> vector<8x128xf32>
    %293 = vector.extract_strided_slice %233 {offsets = [1, 0], sizes = [1, 128], strides = [1, 1]} : vector<6x128xf32> to vector<1x128xf32>
    %294 = vector.broadcast %293 : vector<1x128xf32> to vector<8x128xf32>
    %295 = arith.addf %292, %294 : vector<8x128xf32>
    %296 = arith.addf %264, %295 : vector<8x128xf32>
    %297 = vector.extract_strided_slice %233 {offsets = [4, 0], sizes = [1, 128], strides = [1, 1]} : vector<6x128xf32> to vector<1x128xf32>
    %298 = vector.extract_strided_slice %233 {offsets = [5, 0], sizes = [1, 128], strides = [1, 1]} : vector<6x128xf32> to vector<1x128xf32>
    %cst_75 = arith.constant dense<0.000000e+00> : vector<8xf32>
    %299 = vector.multi_reduction <add>, %296, %cst_75 [1] : vector<8x128xf32> to vector<8xf32>
    %300 = vector.shape_cast %299 : vector<8xf32> to vector<8x1xf32>
    %cst_76 = arith.constant 1.280000e+02 : f32
    %301 = vector.broadcast %cst_76 : f32 to vector<8x1xf32>
    %302 = arith.divf %300, %301 : vector<8x1xf32>
    %303 = vector.broadcast %302 : vector<8x1xf32> to vector<8x128xf32>
    %304 = arith.subf %296, %303 : vector<8x128xf32>
    %305 = arith.mulf %304, %304 : vector<8x128xf32>
    %cst_77 = arith.constant dense<0.000000e+00> : vector<8xf32>
    %306 = vector.multi_reduction <add>, %305, %cst_77 [1] : vector<8x128xf32> to vector<8xf32>
    %307 = vector.shape_cast %306 : vector<8xf32> to vector<8x1xf32>
    %cst_78 = arith.constant 1.280000e+02 : f32
    %308 = vector.broadcast %cst_78 : f32 to vector<8x1xf32>
    %309 = arith.divf %307, %308 : vector<8x1xf32>
    %cst_79 = arith.constant 9.99999996E-13 : f32
    %310 = vector.broadcast %cst_79 : f32 to vector<8x1xf32>
    %311 = arith.addf %309, %310 : vector<8x1xf32>
    %312 = math.rsqrt %311 : vector<8x1xf32>
    %313 = vector.broadcast %312 : vector<8x1xf32> to vector<8x128xf32>
    %314 = arith.mulf %304, %313 : vector<8x128xf32>
    %315 = vector.broadcast %297 : vector<1x128xf32> to vector<8x128xf32>
    %316 = arith.mulf %314, %315 : vector<8x128xf32>
    %317 = vector.broadcast %298 : vector<1x128xf32> to vector<8x128xf32>
    %318 = arith.addf %316, %317 : vector<8x128xf32>
    %c2_i32 = arith.constant 2 : i32
    %319 = vector.extract_strided_slice %318 {offsets = [0, 0], sizes = [1, 128], strides = [1, 1]} : vector<8x128xf32> to vector<1x128xf32>
    %320 = arith.truncf %319 : vector<1x128xf32> to vector<1x128xbf16>
    %c0_80 = arith.constant 0 : index
    %c0_81 = arith.constant 0 : index
    %321 = vector.load %arg9[%c0_80, %c0_81] : memref<128x128xbf16, #tpu.memory_space<vmem>>, vector<128x128xbf16>
    %cst_82 = arith.constant dense<0.000000e+00> : vector<1x128xf32>
    %322 = tpu.matmul %320, %321, %cst_82 {dimension_numbers = #tpu.dot_dimension_numbers<[1], [0], [0], [1], [0, 0, 1, 1], [], []>} : vector<1x128xbf16>, vector<128x128xbf16>, vector<1x128xf32> -> vector<1x128xf32>
    %c0_83 = arith.constant 0 : index
    %c0_84 = arith.constant 0 : index
    %323 = vector.load %arg10[%c0_83, %c0_84] : memref<1x128xf32, #tpu.memory_space<vmem>>, vector<1x128xf32>
    %324 = arith.addf %322, %323 : vector<1x128xf32>
    %325 = math.tanh %324 : vector<1x128xf32>
    %c0_85 = arith.constant 0 : index
    %c0_86 = arith.constant 0 : index
    %326 = vector.load %arg11[%c0_85, %c0_86] : memref<1x128xf32, #tpu.memory_space<vmem>>, vector<1x128xf32>
    tpu.vector_store %arg11[%c0_85, %c0_86], %325 {strides = array<i32>} : memref<1x128xf32, #tpu.memory_space<vmem>>, vector<1x128xf32>,
    return
  }
}

</mosaic_0001>

<bundles_post_ra>
// kernel: bert_forward.1
= control target key start
LH: loop header
LB: loop body
LE: loop exit
PB: predicated region body
PF: predicated region fallthrough
CT: control target
= control target key end

     0   :  { %16 = vsyncpa [#allocation3], 0  ;;  %s5228_s0 = inlined_call_operand.vmem [shape: f32[8,128], index: 0, kind: input, shape index: {}]   ;;  %s5229_s1 = inlined_call_operand.vmem [shape: f32[2,128], index: 1, kind: input, shape index: {}]   ;;  %s5230_s2 = inlined_call_operand.hbm [shape: bf16[2,128,384], index: 2, kind: input, shape index: {}]   ;;  %s5231_s3 = inlined_call_operand.hbm [shape: f32[2,1,384], index: 3, kind: input, shape index: {}]   ;;  %s5232_s4 = inlined_call_operand.vmem [shape: bf16[2,128,128], index: 4, kind: input, shape index: {}]   ;;  %s5233_s5 = inlined_call_operand.hbm [shape: bf16[2,128,512], index: 5, kind: input, shape index: {}]   ;;  %s5234_s6 = inlined_call_operand.hbm [shape: f32[2,1,512], index: 6, kind: input, shape index: {}]   ;;  %s5235_s7 = inlined_call_operand.hbm [shape: bf16[2,512,128], index: 7, kind: input, shape index: {}]   ;;  %s5236_s8 = inlined_call_operand.vmem [shape: f32[2,6,128], index: 8, kind: input, shape index: {}]   ;;  %s5237_s9 = inlined_call_operand.vmem [shape: bf16[128,128], index: 9, kind: input, shape index: {}]   ;;  %s5238_s10 = inlined_call_operand.hbm [shape: f32[1,128], index: 10, kind: input, shape index: {}]   ;;  %s5239_s11 = inlined_call_operand.hbm [shape: f32[1,128], index: 11, kind: output, shape index: {}]  }
   0x1   :  { %17 = vsyncpa [#allocation6], 0 }
   0x2   :  { %18 = vsyncpa [#allocation9], 0 }
   0x3   :  { %19 = vsyncpa [#allocation12], 0 }
   0x4   :  { %20 = vsyncpa [#allocation4], 0  ;;  %s4693_s17 = smov [#allocation5]   ;;  %s4529_s21 = scalar_lea.hbm %s5231_s3, 96 }
   0x5   :  { %s42_s18 = sshll.u32 %s4693_s17, 4  ;;  %p4530_p0 = scmp.ne.s32.totalorder %s5231_s3, %s4529_s21  ;;  %s43_s18 = int_to_ptr.vmem [resolvable:$true] %s42_s18 }
   0x6   :  { %p4533_p1 = scmp.lt.u32.totalorder %s4529_s21, %s5231_s3 }
   0x8   :  { %p4535_p2 = pnand %p4533_p1, %p4530_p0 }
   0xa   :  { %4538 = shalt.err (!%p4535_p2)
}
   0xb   :  { %s4539_s26 = scalar_lea.vmem %s43_s18, 96  ;;  %p4544_p4 = scmp.lt.s32.totalorder %s43_s18, %s43_s18 }
   0xc   :  { %p4540_p3 = scmp.ne.s32.totalorder %s43_s18, %s4539_s26  ;;  %p4545_p5 = scmp.lt.s32.totalorder %s4539_s26, %s4539_s26 }
   0xe   :  { %p4546_p6 = por %p4545_p5, %p4544_p4 }
  0x10   :  { %p4547_p7 = pnand %p4546_p6, %p4540_p3 }
  0x12   :  { %4550 = shalt.err (!%p4547_p7)
}
  0x13   :  { %s4694_s27 = smov 48   ;;  %s4695_s28 = smov 3  }
  0x14   :  { %48 = dma.hbm_to_vmem [thread:$0]  %s5231_s3, 96, %s43_s18, [#allocation6], %s4694_s27, %s4694_s27, %s4695_s28  }
  0x15   :  { %s4696_s12 = smov [#allocation8]   ;;  %s4551_s16 = scalar_lea.hbm %s5234_s6, 128 }
  0x16   :  { %s68_s13 = sshll.u32 %s4696_s12, 4  ;;  %p4552_p8 = scmp.ne.s32.totalorder %s5234_s6, %s4551_s16  ;;  %s69_s13 = int_to_ptr.vmem [resolvable:$true] %s68_s13 }
  0x17   :  { %p4555_p9 = scmp.lt.u32.totalorder %s4551_s16, %s5234_s6 }
  0x19   :  { %p4557_p10 = pnand %p4555_p9, %p4552_p8 }
  0x1b   :  { %4560 = shalt.err (!%p4557_p10)
}
  0x1c   :  { %s4561_s22 = scalar_lea.vmem %s69_s13, 128  ;;  %p4566_p12 = scmp.lt.s32.totalorder %s69_s13, %s69_s13 }
  0x1d   :  { %p4562_p11 = scmp.ne.s32.totalorder %s69_s13, %s4561_s22  ;;  %p4567_p13 = scmp.lt.s32.totalorder %s4561_s22, %s4561_s22 }
  0x1f   :  { %p4568_p0 = por %p4567_p13, %p4566_p12 }
  0x21   :  { %p4569_p1 = pnand %p4568_p0, %p4562_p11 }
  0x23   :  { %4572 = shalt.err (!%p4569_p1)
}
  0x24   :  { %s4697_s3 = smov 64   ;;  %s4698_s18 = smov 4  }
  0x25   :  { %74 = dma.hbm_to_vmem [thread:$0]  %s5234_s6, 128, %s69_s13, [#allocation9], %s4697_s3, %s4697_s3, %s4698_s18  }
  0x26   :  { %s4699_s25 = smov [#allocation2]   ;;  %s4573_s29 = scalar_lea.hbm %s5230_s2, 6144 }
  0x27   :  { %s30_s26 = sshll.u32 %s4699_s25, 4  ;;  %p4574_p2 = scmp.ne.s32.totalorder %s5230_s2, %s4573_s29  ;;  %s31_s26 = int_to_ptr.vmem [resolvable:$true] %s30_s26 }
  0x28   :  { %p4577_p3 = scmp.lt.u32.totalorder %s4573_s29, %s5230_s2 }
  0x2a   :  { %p4579_p4 = pnand %p4577_p3, %p4574_p2 }
  0x2c   :  { %4582 = shalt.err (!%p4579_p4)
}
  0x2d   :  { %s4583_s16 = scalar_lea.vmem %s31_s26, 6144  ;;  %p4588_p6 = scmp.lt.s32.totalorder %s31_s26, %s31_s26 }
  0x2e   :  { %p4584_p5 = scmp.ne.s32.totalorder %s31_s26, %s4583_s16  ;;  %p4589_p7 = scmp.lt.s32.totalorder %s4583_s16, %s4583_s16 }
  0x30   :  { %p4590_p8 = por %p4589_p7, %p4588_p6 }
  0x32   :  { %p4591_p9 = pnand %p4590_p8, %p4584_p5 }
  0x34   :  { %4594 = shalt.err (!%p4591_p9)
}
  0x35   :  { %s4700_s6 = smov 192   ;;  %s4701_s13 = smov 12  }
  0x36   :  { %36 = dma.hbm_to_vmem [thread:$0]  %s5230_s2, 6144, %s31_s26, [#allocation3], %s4700_s6, %s4700_s6, %s4701_s13  }
  0x37   :  { %s4702_s20 = smov [#allocation7]   ;;  %s4595_s24 = scalar_lea.hbm %s5233_s5, 8192 }
  0x38   :  { %s56_s21 = sshll.u32 %s4702_s20, 4  ;;  %p4596_p10 = scmp.ne.s32.totalorder %s5233_s5, %s4595_s24  ;;  %s57_s21 = int_to_ptr.vmem [resolvable:$true] %s56_s21 }
  0x39   :  { %p4599_p11 = scmp.lt.u32.totalorder %s4595_s24, %s5233_s5 }
  0x3b   :  { %p4601_p12 = pnand %p4599_p11, %p4596_p10 }
  0x3d   :  { %4604 = shalt.err (!%p4601_p12)
}
  0x3e   :  { %s4605_s30 = scalar_lea.vmem %s57_s21, 8192  ;;  %p4610_p0 = scmp.lt.s32.totalorder %s57_s21, %s57_s21 }
  0x3f   :  { %p4606_p13 = scmp.ne.s32.totalorder %s57_s21, %s4605_s30  ;;  %p4611_p1 = scmp.lt.s32.totalorder %s4605_s30, %s4605_s30 }
  0x41   :  { %p4612_p2 = por %p4611_p1, %p4610_p0 }
  0x43   :  { %p4613_p3 = pnand %p4612_p2, %p4606_p13 }
  0x45   :  { %4616 = shalt.err (!%p4613_p3)
}
  0x46   :  { %s4703_s2 = smov 256   ;;  %s4704_s26 = smov 16  }
  0x47   :  { %62 = dma.hbm_to_vmem [thread:$0]  %s5233_s5, 8192, %s57_s21, [#allocation6], %s4703_s2, %s4703_s2, %s4704_s26  }
  0x48   :  { %s4705_s15 = smov [#allocation10]   ;;  %s4706_s6 = smov [#allocation11]  }
  0x49   :  { %s80_s16 = sshll.u32 %s4705_s15, 4  ;;  %s97_s13 = sshll.u32 %s4706_s6, 4  ;;  %s81_s16 = int_to_ptr.vmem [resolvable:$true] %s80_s16  ;;  %s98_s13 = int_to_ptr.vmem [resolvable:$true] %s97_s13 }
  0x4a   :  { %s4617_s20 = scalar_lea.hbm %s5235_s7, 8192 }
  0x4b   :  { %p4618_p4 = scmp.ne.s32.totalorder %s5235_s7, %s4617_s20  ;;  %p4621_p5 = scmp.lt.u32.totalorder %s4617_s20, %s5235_s7 }
  0x4d   :  { %p4623_p6 = pnand %p4621_p5, %p4618_p4 }
  0x4f   :  { %4626 = shalt.err (!%p4623_p6)
}
  0x50   :  { %s4627_s5 = scalar_lea.vmem %s81_s16, 8192  ;;  %p4632_p8 = scmp.lt.s32.totalorder %s81_s16, %s81_s16 }
  0x51   :  { %p4628_p7 = scmp.ne.s32.totalorder %s81_s16, %s4627_s5  ;;  %p4633_p9 = scmp.lt.s32.totalorder %s4627_s5, %s4627_s5 }
  0x53   :  { %p4634_p10 = por %p4633_p9, %p4632_p8 }
  0x55   :  { %p4635_p11 = pnand %p4634_p10, %p4628_p7 }
  0x57   :  { %4638 = shalt.err (!%p4635_p11)
}
  0x58   :  { %86 = dma.hbm_to_vmem [thread:$0]  %s5235_s7, 8192, %s81_s16, [#allocation9], %s4697_s3, %s4697_s3, %s4698_s18  }
  0x59   :  { %s4639_s30 = scalar_lea.hbm %s5238_s10, 16 }
  0x5a   :  { %p4640_p12 = scmp.ne.s32.totalorder %s5238_s10, %s4639_s30  ;;  %p4643_p13 = scmp.lt.u32.totalorder %s4639_s30, %s5238_s10 }
  0x5c   :  { %p4645_p0 = pnand %p4643_p13, %p4640_p12 }
  0x5e   :  { %4648 = shalt.err (!%p4645_p0)
}
  0x5f   :  { %s4649_s15 = scalar_lea.vmem %s98_s13, 16  ;;  %s4653_s6 = scalar_lea.vmem %s98_s13, 32 }
  0x60   :  { %p4650_p1 = scmp.ne.s32.totalorder %s98_s13, %s4649_s15  ;;  %p4654_p2 = scmp.lt.s32.totalorder %s98_s13, %s98_s13 }
  0x61   :  { %p4655_p3 = scmp.lt.s32.totalorder %s4653_s6, %s4649_s15 }
  0x63   :  { %p4656_p4 = por %p4655_p3, %p4654_p2 }
  0x65   :  { %p4657_p5 = pnand %p4656_p4, %p4650_p1 }
  0x67   :  { %4660 = shalt.err (!%p4657_p5)
}
  0x68   :  { %100 = dma.hbm_to_vmem [thread:$0]  %s5238_s10, 16, %s98_s13, [#allocation12]  }
  0x69   :  { %4683 = dma.done.wait [#allocation3], 6144  }
  0x6a   :  { %4684 = vsyncadd [#allocation3], 4294961152 }
  0x6b   :  { %4685 = dma.done.wait [#allocation6], 8288  }
  0x6c   :  { %4686 = vsyncadd [#allocation6], 4294959008 }
  0x6d   :  { %4687 = dma.done.wait [#allocation9], 8320  }
  0x6e   :  { %4688 = vsyncadd [#allocation9], 4294958976 }
  0x6f   :  { %4689 = dma.done.wait [#allocation12], 16  }
  0x70   :  { %4690 = vsyncadd [#allocation12], 4294967280  ;;  %v120_v0 = vld [vmem:[%s5228_s0] sm:$0xff]  ;;  %v4707_v3 = vmov 0.0   ;;  %v4224_v4 = vld [vmem:[#allocation2 + $0x8] ss:$12 sps:$4 sm:$0xff]   ;;  %v180_v41 = vlaneseq }
  0x71   :  { %123 = vadd.xlane.f32.xlu0 %v120_v0  ;;  %v4221_v1 = vld [vmem:[#allocation2 + $0x4] ss:$12 sps:$4 sm:$0xff]   ;;  %v4223_v2 = vld [vmem:[#allocation2] ss:$12 sps:$4 sm:$0xff]   ;;  %4013 = vmatprep.subr.bf16.mxu1 %v4707_v3  ;;  %v4225_v5 = vld [vmem:[#allocation2 + $0x1c] ss:$12 sps:$4 sm:$0xff]  }
  0x72   :  { %v4227_v6 = vld [vmem:[#allocation2 + $0x18] ss:$12 sps:$4 sm:$0xff]   ;;  %323 = vmatprep.subr.bf16.mxu0 %v4221_v1  ;;  %v4228_v7 = vld [vmem:[#allocation2 + $0x20] ss:$12 sps:$4 sm:$0xff]   ;;  %4014 = vmatpush3.bf16.msra.mxu1 %v4224_v4  ;;  %v4231_v13 = vld [vmem:[#allocation2 + $0x30] ss:$12 sps:$4 sm:$0xff]  }
  0x73   :  { %v4229_v8 = vld [vmem:[#allocation2 + $0x34] ss:$12 sps:$4 sm:$0xff]   ;;  %324 = vmatpush1.bf16.msra.mxu0 %v4223_v2  ;;  %4015 = vmatprep.subr.bf16.mxu1 %v4707_v3  ;;  %v4232_v14 = vld [vmem:[#allocation2 + $0x38] ss:$12 sps:$4 sm:$0xff]   ;;  %v4236_v17 = vld [vmem:[#allocation2 + $0x50] ss:$12 sps:$4 sm:$0xff]  }
  0x74   :  { %325 = vmatprep.subr.bf16.mxu0 %v4225_v5  ;;  %v4233_v15 = vld [vmem:[#allocation2 + $0x4c] ss:$12 sps:$4 sm:$0xff]   ;;  %v4235_v16 = vld [vmem:[#allocation2 + $0x48] ss:$12 sps:$4 sm:$0xff]   ;;  %v4237_v18 = vld [vmem:[#allocation2 + $0x64] ss:$12 sps:$4 sm:$0xff]  }
  0x75   :  { %v4239_v19 = vld [vmem:[#allocation2 + $0x60] ss:$12 sps:$4 sm:$0xff]   ;;  %v4240_v20 = vld [vmem:[#allocation2 + $0x68] ss:$12 sps:$4 sm:$0xff]   ;;  %v4243_v22 = vld [vmem:[#allocation2 + $0x78] ss:$12 sps:$4 sm:$0xff]  }
  0x76   :  { %4016 = vmatpush3.bf16.msra.mxu1 %v4228_v7  ;;  %v4241_v21 = vld [vmem:[#allocation2 + $0x7c] ss:$12 sps:$4 sm:$0xff]   ;;  %v4244_v23 = vld [vmem:[#allocation2 + $0x80] ss:$12 sps:$4 sm:$0xff]   ;;  %v4708_v25 = vmov 0   ;;  %vm4709_vm0 = vmmov 0  }
  0x77   :  { %326 = vmatpush1.bf16.msra.mxu0 %v4227_v6  ;;  %4017 = vmatprep.subr.bf16.mxu1 %v4707_v3  ;;  %v4245_v24 = vld [vmem:[#allocation2 + $0x94] ss:$12 sps:$4 sm:$0xff]   ;;  %v4247_v26 = vld [vmem:[#allocation2 + $0x90] ss:$12 sps:$4 sm:$0xff]   ;;  %v4248_v27 = vld [vmem:[#allocation2 + $0x98] ss:$12 sps:$4 sm:$0xff]  }
  0x78   :  { %327 = vmatprep.subr.bf16.mxu0 %v4229_v8  ;;  %355 = vmatprep.mubr.bf16.mxu0 %v4708_v25  ;;  %v4249_v28 = vld [vmem:[#allocation2 + $0xac] ss:$12 sps:$4 sm:$0xff]   ;;  %v4251_v29 = vld [vmem:[#allocation2 + $0xa8] ss:$12 sps:$4 sm:$0xff]   ;;  %v4252_v30 = vld [vmem:[#allocation2 + $0xb0] ss:$12 sps:$4 sm:$0xff]  }
  0x79   :  { %4029 = vmatprep.mubr.msk.bf16.mxu1 %vm4709_vm0, %v4707_v3  ;;  %v3605_v35 = vld [vmem:[%s5229_s1] ss:$0 sm:$0xff]  ;;  %v3606_v37 = vld [vmem:[%s5229_s1 + $0x1] ss:$0 sm:$0xff]  ;;  %v4881_v42 = vshrl.u32 %v180_v41, 7  ;;  %vm428_vm1 = vcmask 261120  }
  0x7a   :  { %4018 = vmatpush3.bf16.msra.mxu1 %v4232_v14  ;;  %v178_v44 = vld [vmem:[#allocation5] sm:$0x7]  ;;  %s4710_s1 = smov 96   ;;  %s4711_s20 = smov 32   ;;  %vm781_vm2 = vcmask 1043456   ;;  %vm725_vm3 = vcmask 64512  }
  0x7b   :  { %328 = vmatpush1.bf16.msra.mxu0 %v4231_v13  ;;  %4019 = vmatprep.subr.bf16.mxu1 %v4707_v3  ;;  %v4884_v43 = vsub.s32 0, %v4881_v42  ;;  %v4887_v45 = vsub.s32 1, %v4881_v42  ;;  %v4903_v58 = vsub.s32 2, %v4881_v42  ;;  %vm976_vm4 = vcmask 523264  }
  0x7c   :  { %329 = vmatprep.subr.bf16.mxu0 %v4233_v15  ;;  %vm978_vm5 = vcmask 785408  }
  0x7d   :  { %v183_v46 = vrot.slane %v178_v44, %v4884_v43  ;;  %v187_v47 = vrot.slane %v178_v44, %v4887_v45  ;;  %v191_v59 = vrot.slane %v178_v44, %v4903_v58 }
  0x7e   :  { %4020 = vmatpush3.bf16.msra.mxu1 %v4236_v17 }
  0x7f   :  { %330 = vmatpush1.bf16.msra.mxu0 %v4235_v16  ;;  %4021 = vmatprep.subr.bf16.mxu1 %v4707_v3 }
  0x80   :  { %331 = vmatprep.subr.bf16.mxu0 %v4237_v18 }
  0x82   :  { %4022 = vmatpush3.bf16.msra.mxu1 %v4240_v20 }
  0x83   :  { %332 = vmatpush1.bf16.msra.mxu0 %v4239_v19  ;;  %4023 = vmatprep.subr.bf16.mxu1 %v4707_v3 }
  0x84   :  { %333 = vmatprep.subr.bf16.mxu0 %v4241_v21 }
  0x86   :  { %4024 = vmatpush3.bf16.msra.mxu1 %v4244_v23 }
  0x87   :  { %334 = vmatpush1.bf16.msra.mxu0 %v4243_v22  ;;  %4025 = vmatprep.subr.bf16.mxu1 %v4707_v3 }
  0x88   :  { %335 = vmatprep.subr.bf16.mxu0 %v4245_v24 }
  0x8a   :  { %4026 = vmatpush3.bf16.msra.mxu1 %v4248_v27 }
  0x8b   :  { %336 = vmatpush1.bf16.msra.mxu0 %v4247_v26  ;;  %4027 = vmatprep.subr.bf16.mxu1 %v4707_v3 }
  0x8c   :  { %337 = vmatprep.subr.bf16.mxu0 %v4249_v28 }
  0x8e   :  { %4028 = vmatpush3.bf16.msra.mxu1 %v4252_v30 }
  0x8f   :  { %338 = vmatpush1.bf16.msra.mxu0 %v4251_v29  ;;  %4038 = vmatprep.subr.mxu1 %v4707_v3 }
  0x90   :  { %4033 = vmatprep.subr.mxu0 %v4707_v3 }
  0xfe   :  { %v124_v9 = vpop.xlane.xlu0 %123 }
  0xff   :  { %v126_v10 = vmul.f32 0.0078125, %v124_v9 }
 0x101   :  { %v127_v11 = vsub.f32 %v120_v0, %v126_v10 }
 0x103   :  { %v128_v12 = vmul.f32 %v127_v11, %v127_v11 }
 0x105   :  { %129 = vadd.xlane.f32.xlu0 %v128_v12 }
 0x192   :  { %v130_v31 = vpop.xlane.xlu0 %129 }
 0x193   :  { %v131_v32 = vmul.f32 0.0078125, %v130_v31 }
 0x195   :  { %v132_v33 = vadd.f32 1e-12, %v131_v32 }
 0x197   :  { %4469 = vrsqrt.f32 %v132_v33 }
 0x1a1   :  { %v4470_v34 = vpop.eup %4469 }
 0x1a2   :  { %v134_v36 = vmul.f32 %v4470_v34, %v127_v11 }
 0x1a4   :  { %v139_v38 = vmul.f32 %v3605_v35, %v134_v36 }
 0x1a6   :  { %v4873_v39 = vadd.f32 %v3606_v37, %v139_v38 }
 0x1a8   :  { %v145_v40 = vpack.c.bf16 %v4873_v39, %v4873_v39 }
 0x1aa   :  { %356 = vmatmul.mubr.bf16.vlgmr.msra.gmra.mrb[0].mxu0 %v145_v40  ;;  %4030 = vmatmul.mubr.bf16.vlgmr.msra.gmra.mrb[0].mxu1 %v145_v40 }
 0x1ab   :  { %4035 = vmatprep.mubr.msk.f32.mxu0 %vm4709_vm0, %v4707_v3  ;;  %4040 = vmatprep.mubr.msk.f32.mxu1 %vm4709_vm0, %v4707_v3 }
 0x27d   :  { %v357_v48 = vpop.f32.mrb[0].mxu0  ;;  %v398_v49 = vpop.f32.mrb[0].mxu1 }
 0x27e   :  { %v358_v50 = vadd.f32 %v357_v48, %v183_v46  ;;  %v359_v51 = vpop.f32.mrb[1].mxu0  ;;  %v4031_v52 = vpop.f32.mrb[1].mxu1  ;;  %v4906_v61 = vadd.f32 %v398_v49, %v191_v59 }
 0x27f   :  { %v360_v53 = vadd.f32 %v359_v51, %v187_v47  ;;  %v361_v54 = vpop.f32.mrb[2].mxu0  ;;  %v401_v55 = vpop.f32.mrb[2].mxu1 }
 0x280   :  { %v362_v56 = vpop.f32.mrb[3].mxu0  ;;  %v4032_v57 = vpop.f32.mrb[3].mxu1  ;;  %405 = vrot.lane.b32.xlu1 %v358_v50, %s4710_s1  ;;  %v774_v0 = vpack.c.bf16 %v4906_v61, %v4906_v61 }
 0x281   :  { %414 = vrot.lane.b32.xlu0 %v360_v53, %s4697_s3  ;;  %4034 = vmatpush3.xpose.msk.msra.mxu0 %vm428_vm1, %v360_v53 }
 0x282   :  { %4043 = vmatprep.subr.mxu0 %v4707_v3  ;;  %v783_v2 = vsel %vm781_vm2, %v774_v0, 0 }
 0x284   :  { %412 = vrot.lane.b32.xlu1 %v360_v53, %s4710_s1  ;;  %4036 = vmatmul.mubr.msk.f32.vlgmr.msra.gmra.mrb[4].mxu0 %vm428_vm1, %v358_v50 }
 0x285   :  { %4045 = vmatprep.mubr.msk.f32.mxu0 %vm4709_vm0, %v4707_v3 }
 0x288   :  { %407 = vrot.lane.b32.xlu1 %v358_v50, %s4697_s3 }
 0x28c   :  { %416 = vrot.lane.b32.xlu1 %v360_v53, %s4711_s20 }
 0x290   :  { %409 = vrot.lane.b32.xlu1 %v358_v50, %s4711_s20 }
 0x2f2   :  { %v406_v60 = vpop.permute.xlu1 %405 }
 0x2f3   :  { %v415_v62 = vpop.permute.xlu0 %414 }
 0x2f4   :  { %4044 = vmatpush3.xpose.msk.msra.mxu0 %vm428_vm1, %v415_v62 }
 0x2f5   :  { %4053 = vmatprep.subr.bf16.mxu0 %v4707_v3 }
 0x2f6   :  { %v413_v63 = vpop.permute.xlu1 %412 }
 0x2f7   :  { %4039 = vmatpush3.xpose.msk.msra.mxu1 %vm428_vm1, %v413_v63 }
 0x2f8   :  { %4048 = vmatprep.subr.mxu1 %v4707_v3 }
 0x2fa   :  { %4041 = vmatmul.mubr.msk.f32.vlgmr.msra.gmra.mrb[4].mxu1 %vm428_vm1, %v406_v60  ;;  %v408_v1 = vpop.permute.xlu1 %407 }
 0x2fb   :  { %4046 = vmatmul.mubr.msk.f32.vlgmr.msra.gmra.mrb[6].mxu0 %vm428_vm1, %v408_v1  ;;  %4050 = vmatprep.mubr.msk.f32.mxu1 %vm4709_vm0, %v4707_v3 }
 0x2fc   :  { %4054 = vmatpush3.bf16.msra.mxu0 %v783_v2  ;;  %4055 = vmatprep.mubr.msk.bf16.mxu0 %vm4709_vm0, %v4707_v3 }
 0x2fd   :  { %4065 = vmatprep.subr.bf16.mxu0 %v4707_v3 }
 0x2fe   :  { %v417_v4 = vpop.permute.xlu1 %416 }
 0x2ff   :  { %4049 = vmatpush3.xpose.msk.msra.mxu1 %vm428_vm1, %v417_v4 }
 0x300   :  { %4059 = vmatprep.subr.bf16.mxu1 %v4707_v3 }
 0x302   :  { %v410_v5 = vpop.permute.xlu1 %409 }
 0x303   :  { %4051 = vmatmul.mubr.msk.f32.vlgmr.msra.gmra.mrb[6].mxu1 %vm428_vm1, %v410_v5 }
 0x304   :  { %4061 = vmatprep.mubr.msk.bf16.mxu1 %vm4709_vm0, %v4707_v3 }
 0x357   :  { %v499_v6 = vpop.f32.mrb[4].mxu0 }
 0x358   :  { %v4037_v7 = vpop.f32.mrb[5].mxu0  ;;  %v726_v8 = vsel %vm725_vm3, %v499_v6, -inf }
 0x359   :  { %727 = vmax.xlane.f32.xlu1 %v726_v8 }
 0x3cd   :  { %v573_v9 = vpop.f32.mrb[4].mxu1 }
 0x3ce   :  { %v4042_v10 = vpop.f32.mrb[5].mxu1  ;;  %v647_v11 = vpop.f32.mrb[6].mxu0  ;;  %v729_v12 = vsel %vm725_vm3, %v573_v9, -inf }
 0x3cf   :  { %730 = vmax.xlane.f32.xlu0 %v729_v12  ;;  %v4047_v13 = vpop.f32.mrb[7].mxu0  ;;  %v732_v14 = vsel %vm725_vm3, %v647_v11, -inf  ;;  %v4253_v10 = vld [vmem:[%s5232_s4] sm:$0xff]   ;;  %v4255_v12 = vld [vmem:[%s5232_s4 + $0x10] sm:$0xff]  }
 0x3d0   :  { %733 = vmax.xlane.f32.xlu1 %v732_v14  ;;  %v4256_v13 = vld [vmem:[%s5232_s4 + $0x18] sm:$0xff]  }
 0x3d6   :  { %v721_v15 = vpop.f32.mrb[6].mxu1 }
 0x3d7   :  { %v4052_v16 = vpop.f32.mrb[7].mxu1  ;;  %v735_v17 = vsel %vm725_vm3, %v721_v15, -inf }
 0x3d8   :  { %736 = vmax.xlane.f32.xlu1 %v735_v17 }
 0x3e6   :  { %v728_v18 = vpop.xlane.xlu1 %727 }
 0x3e7   :  { %v738_v19 = vsub.f32 %v499_v6, %v728_v18 }
 0x3e9   :  { %v742_v20 = vmul.f32 1.442695, %v738_v19 }
 0x3eb   :  { %4471 = vpow2.f32 %v742_v20 }
 0x3f5   :  { %v4472_v21 = vpop.eup %4471 }
 0x3f6   :  { %v750_v22 = vsel %vm725_vm3, %v4472_v21, 0.0 }
 0x3f7   :  { %751 = vadd.xlane.f32.xlu0 %v750_v22 }
 0x45c   :  { %v731_v23 = vpop.xlane.xlu0 %730 }
 0x45d   :  { %v739_v24 = vsub.f32 %v573_v9, %v731_v23  ;;  %v734_v26 = vpop.xlane.xlu1 %733  ;;  %v4258_v23 = vld [vmem:[%s5232_s4 + $0x28] sm:$0xff]  }
 0x45e   :  { %v740_v27 = vsub.f32 %v647_v11, %v734_v26  ;;  %v4254_v11 = vld [vmem:[%s5232_s4 + $0x8] sm:$0xff]   ;;  %v4260_v26 = vld [vmem:[%s5232_s4 + $0x38] sm:$0xff]  }
 0x45f   :  { %v744_v28 = vmul.f32 1.442695, %v739_v24  ;;  %v4259_v24 = vld [vmem:[%s5232_s4 + $0x30] sm:$0xff]  }
 0x460   :  { %v746_v29 = vmul.f32 1.442695, %v740_v27 }
 0x461   :  { %4473 = vpow2.f32 %v744_v28 }
 0x462   :  { %4475 = vpow2.f32 %v746_v29 }
 0x465   :  { %v737_v35 = vpop.xlane.xlu1 %736 }
 0x466   :  { %v741_v36 = vsub.f32 %v721_v15, %v737_v35 }
 0x468   :  { %v748_v38 = vmul.f32 1.442695, %v741_v36 }
 0x46b   :  { %v4474_v30 = vpop.eup %4473 }
 0x46c   :  { %v4476_v31 = vpop.eup %4475  ;;  %v753_v32 = vsel %vm725_vm3, %v4474_v30, 0.0 }
 0x46d   :  { %754 = vadd.xlane.f32.xlu1 %v753_v32  ;;  %v756_v33 = vsel %vm725_vm3, %v4476_v31, 0.0 }
 0x46e   :  { %757 = vadd.xlane.f32.xlu0 %v756_v33 }
 0x47e   :  { %422 = vrot.lane.b32.xlu1 %v4906_v61, %s4697_s3 }
 0x484   :  { %v752_v34 = vpop.xlane.xlu0 %751  ;;  %419 = vrot.lane.b32.xlu0 %v4906_v61, %s4710_s1 }
 0x485   :  { %4477 = vrcp.f32 %v752_v34 }
 0x486   :  { %4479 = vpow2.f32 %v748_v38  ;;  %v4998_v38 = vld [vmem:[%s5236_s8] sm:$0x3f] }
 0x48f   :  { %v4478_v37 = vpop.eup %4477 }
 0x490   :  { %v766_v40 = vmul.f32 %v4478_v37, %v4472_v21  ;;  %v4480_v44 = vpop.eup %4479  ;;  %v4257_v21 = vld [vmem:[%s5232_s4 + $0x20] sm:$0xff]  }
 0x491   :  { %v759_v46 = vsel %vm725_vm3, %v4480_v44, 0.0 }
 0x492   :  { %v770_v41 = vpack.c.bf16 %v766_v40, %v766_v40  ;;  %v1001_v40 = vrot.slane %v4998_v38, %v4884_v43 }
 0x494   :  { %4056 = vmatmul.mubr.msk.bf16.vlgmr.msra.gmra.mrb[8].mxu0 %vm725_vm3, %v770_v41 }
 0x495   :  { %4067 = vmatprep.mubr.msk.bf16.mxu0 %vm4709_vm0, %v4707_v3 }
 0x4a2   :  { %760 = vadd.xlane.f32.xlu1 %v759_v46 }
 0x4b3   :  { %425 = vrot.lane.b32.xlu1 %v4906_v61, %s4711_s20 }
 0x4fa   :  { %v755_v47 = vpop.xlane.xlu1 %754 }
 0x4fb   :  { %4481 = vrcp.f32 %v755_v47  ;;  %v758_v48 = vpop.xlane.xlu0 %757 }
 0x4fc   :  { %4483 = vrcp.f32 %v758_v48 }
 0x4fe   :  { %v423_v49 = vpop.permute.xlu1 %422 }
 0x4ff   :  { %v776_v50 = vpack.c.bf16 %v423_v49, %v423_v49  ;;  %v420_v51 = vpop.permute.xlu0 %419 }
 0x500   :  { %v775_v52 = vpack.c.bf16 %v420_v51, %v420_v51  ;;  %v4263_v51 = vld [vmem:[#allocation7 + $0x4] ss:$16 sps:$4 sm:$0xff]  }
 0x501   :  { %v875_v53 = vsel %vm781_vm2, %v776_v50, 0  ;;  %v4261_v50 = vld [vmem:[#allocation7] ss:$16 sps:$4 sm:$0xff]  }
 0x502   :  { %v829_v54 = vsel %vm781_vm2, %v775_v52, 0  ;;  %4066 = vmatpush3.bf16.msra.mxu0 %v875_v53  ;;  %v4264_v52 = vld [vmem:[#allocation7 + $0x8] ss:$16 sps:$4 sm:$0xff]   ;;  %v4266_v53 = vld [vmem:[#allocation7 + $0xc] ss:$16 sps:$4 sm:$0xff]  }
 0x503   :  { %4060 = vmatpush3.bf16.msra.mxu1 %v829_v54  ;;  %4077 = vmatprep.subr.bf16.mxu0 %v4707_v3  ;;  %v4269_v54 = vld [vmem:[#allocation7 + $0x24] ss:$16 sps:$4 sm:$0xff]  }
 0x504   :  { %4071 = vmatprep.subr.bf16.mxu1 %v4707_v3 }
 0x505   :  { %v4482_v55 = vpop.eup %4481 }
 0x506   :  { %v4484_v56 = vpop.eup %4483  ;;  %v767_v57 = vmul.f32 %v4482_v55, %v4474_v30  ;;  %v4272_v55 = vld [vmem:[#allocation7 + $0x2c] ss:$16 sps:$4 sm:$0xff]  }
 0x507   :  { %v768_v59 = vmul.f32 %v4484_v56, %v4476_v31  ;;  %v4267_v56 = vld [vmem:[#allocation7 + $0x20] ss:$16 sps:$4 sm:$0xff]  }
 0x508   :  { %v771_v60 = vpack.c.bf16 %v767_v57, %v767_v57  ;;  %v4270_v57 = vld [vmem:[#allocation7 + $0x28] ss:$16 sps:$4 sm:$0xff]  }
 0x509   :  { %v772_v61 = vpack.c.bf16 %v768_v59, %v768_v59  ;;  %v4275_v59 = vld [vmem:[#allocation7 + $0x44] ss:$16 sps:$4 sm:$0xff]  }
 0x50a   :  { %4062 = vmatmul.mubr.msk.bf16.vlgmr.msra.gmra.mrb[8].mxu1 %vm725_vm3, %v771_v60  ;;  %v4278_v60 = vld [vmem:[#allocation7 + $0x4c] ss:$16 sps:$4 sm:$0xff]  }
 0x50b   :  { %4068 = vmatmul.mubr.msk.bf16.vlgmr.msra.gmra.mrb[12].mxu0 %vm725_vm3, %v772_v61  ;;  %4073 = vmatprep.mubr.msk.bf16.mxu1 %vm4709_vm0, %v4707_v3  ;;  %v4273_v61 = vld [vmem:[#allocation7 + $0x40] ss:$16 sps:$4 sm:$0xff]  }
 0x50c   :  { %4093 = vmatprep.mubr.msk.bf16.mxu0 %vm4709_vm0, %v4707_v3  ;;  %4078 = vmatpush3.bf16.msra.mxu0 %v4253_v10  ;;  %v4288_v10 = vld [vmem:[#allocation7 + $0x88] ss:$16 sps:$4 sm:$0xff]  }
 0x50d   :  { %4079 = vmatprep.subr.bf16.mxu0 %v4707_v3 }
 0x510   :  { %4080 = vmatpush3.bf16.msra.mxu0 %v4254_v11  ;;  %v4293_v11 = vld [vmem:[#allocation7 + $0xa4] ss:$16 sps:$4 sm:$0xff]  }
 0x511   :  { %4081 = vmatprep.subr.bf16.mxu0 %v4707_v3 }
 0x514   :  { %4082 = vmatpush3.bf16.msra.mxu0 %v4255_v12  ;;  %v4296_v12 = vld [vmem:[#allocation7 + $0xac] ss:$16 sps:$4 sm:$0xff]  }
 0x515   :  { %4083 = vmatprep.subr.bf16.mxu0 %v4707_v3 }
 0x518   :  { %4084 = vmatpush3.bf16.msra.mxu0 %v4256_v13  ;;  %v4291_v13 = vld [vmem:[#allocation7 + $0xa0] ss:$16 sps:$4 sm:$0xff]  }
 0x519   :  { %4085 = vmatprep.subr.bf16.mxu0 %v4707_v3 }
 0x51c   :  { %4086 = vmatpush3.bf16.msra.mxu0 %v4257_v21  ;;  %v4303_v21 = vld [vmem:[#allocation7 + $0xe0] ss:$16 sps:$4 sm:$0xff]  }
 0x51d   :  { %4087 = vmatprep.subr.bf16.mxu0 %v4707_v3 }
 0x520   :  { %4088 = vmatpush3.bf16.msra.mxu0 %v4258_v23 }
 0x521   :  { %4089 = vmatprep.subr.bf16.mxu0 %v4707_v3 }
 0x524   :  { %4090 = vmatpush3.bf16.msra.mxu0 %v4259_v24 }
 0x525   :  { %4091 = vmatprep.subr.bf16.mxu0 %v4707_v3 }
 0x528   :  { %4092 = vmatpush3.bf16.msra.mxu0 %v4260_v26 }
 0x529   :  { %1368 = vmatprep.subr.bf16.mxu0 %v4266_v53  ;;  %v4322_v53 = vld [vmem:[#allocation10 + $0xd8] sm:$0xff]  }
 0x52f   :  { %v761_v62 = vpop.xlane.xlu1 %760 }
 0x530   :  { %4485 = vrcp.f32 %v761_v62 }
 0x533   :  { %v426_v63 = vpop.permute.xlu1 %425 }
 0x534   :  { %v777_v0 = vpack.c.bf16 %v426_v63, %v426_v63 }
 0x536   :  { %v921_v1 = vsel %vm781_vm2, %v777_v0, 0 }
 0x537   :  { %4072 = vmatpush3.bf16.msra.mxu1 %v921_v1 }
 0x538   :  { %1327 = vmatprep.subr.bf16.mxu1 %v4263_v51  ;;  %v4320_v51 = vld [vmem:[#allocation10 + $0x90] sm:$0xff]  }
 0x53a   :  { %v4486_v2 = vpop.eup %4485 }
 0x53b   :  { %v769_v4 = vmul.f32 %v4486_v2, %v4480_v44  ;;  %v4281_v2 = vld [vmem:[#allocation7 + $0x64] ss:$16 sps:$4 sm:$0xff]  }
 0x53d   :  { %v773_v5 = vpack.c.bf16 %v769_v4, %v769_v4  ;;  %v4284_v4 = vld [vmem:[#allocation7 + $0x6c] ss:$16 sps:$4 sm:$0xff]  }
 0x53f   :  { %4074 = vmatmul.mubr.msk.bf16.vlgmr.msra.gmra.mrb[12].mxu1 %vm725_vm3, %v773_v5  ;;  %v4279_v5 = vld [vmem:[#allocation7 + $0x60] ss:$16 sps:$4 sm:$0xff]  }
 0x540   :  { %1359 = vmatprep.mubr.bf16.mxu1 %v4708_v25  ;;  %1328 = vmatpush1.bf16.msra.mxu1 %v4261_v50  ;;  %v4319_v50 = vld [vmem:[#allocation10 + $0x10] sm:$0xff]  }
 0x541   :  { %1329 = vmatprep.subr.bf16.mxu1 %v4269_v54  ;;  %v4323_v54 = vld [vmem:[#allocation10 + $0x18] sm:$0xff]  }
 0x544   :  { %1330 = vmatpush1.bf16.msra.mxu1 %v4267_v56  ;;  %v4325_v56 = vld [vmem:[#allocation10 + $0x60] sm:$0xff]  }
 0x545   :  { %1331 = vmatprep.subr.bf16.mxu1 %v4275_v59  ;;  %v4327_v59 = vld [vmem:[#allocation10 + $0x20] sm:$0xff]  }
 0x548   :  { %1332 = vmatpush1.bf16.msra.mxu1 %v4273_v61  ;;  %v4329_v61 = vld [vmem:[#allocation10 + $0x68] sm:$0xff]  }
 0x549   :  { %1333 = vmatprep.subr.bf16.mxu1 %v4281_v2  ;;  %v4335_v2 = vld [vmem:[#allocation10 + $0x30] sm:$0xff]  }
 0x54c   :  { %1334 = vmatpush1.bf16.msra.mxu1 %v4279_v5  ;;  %v4337_v5 = vld [vmem:[#allocation10 + $0x78] sm:$0xff]  }
 0x567   :  { %v819_v6 = vpop.f32.mrb[8].mxu0 }
 0x568   :  { %v4057_v7 = vpop.f32.mrb[9].mxu0 }
 0x569   :  { %v822_v8 = vpop.f32.mrb[10].mxu0  ;;  %v4287_v7 = vld [vmem:[#allocation7 + $0x84] ss:$16 sps:$4 sm:$0xff]  }
 0x56a   :  { %v4058_v9 = vpop.f32.mrb[11].mxu0  ;;  %v4290_v8 = vld [vmem:[#allocation7 + $0x8c] ss:$16 sps:$4 sm:$0xff]   ;;  %1335 = vmatprep.subr.bf16.mxu1 %v4287_v7  ;;  %v4339_v7 = vld [vmem:[#allocation10 + $0x38] sm:$0xff]  }
 0x56b   :  { %v4285_v9 = vld [vmem:[#allocation7 + $0x80] ss:$16 sps:$4 sm:$0xff]  }
 0x56c   :  { %1336 = vmatpush1.bf16.msra.mxu1 %v4285_v9  ;;  %v1145_v9 = vld [vmem:[#allocation8] sm:$0xf] }
 0x56d   :  { %1337 = vmatprep.subr.bf16.mxu1 %v4293_v11  ;;  %v1158_v11 = vrot.slane %v1145_v9, %v4903_v58 }
 0x570   :  { %1338 = vmatpush1.bf16.msra.mxu1 %v4291_v13 }
 0x5dd   :  { %v865_v14 = vpop.f32.mrb[8].mxu1 }
 0x5de   :  { %964 = vrot.lane.b32.xlu0 %v865_v14, %s4711_s20  ;;  %v4063_v15 = vpop.f32.mrb[9].mxu1  ;;  %v911_v16 = vpop.f32.mrb[12].mxu0  ;;  %v4294_v14 = vld [vmem:[#allocation7 + $0xa8] ss:$16 sps:$4 sm:$0xff]  }
 0x5df   :  { %v868_v17 = vpop.f32.mrb[10].mxu1  ;;  %968 = vrot.lane.b32.xlu1 %v911_v16, %s4697_s3  ;;  %v4069_v18 = vpop.f32.mrb[13].mxu0  ;;  %v4299_v15 = vld [vmem:[#allocation7 + $0xc4] ss:$16 sps:$4 sm:$0xff]   ;;  %v4302_v16 = vld [vmem:[#allocation7 + $0xcc] ss:$16 sps:$4 sm:$0xff]  }
 0x5e0   :  { %v4064_v19 = vpop.f32.mrb[11].mxu1  ;;  %v914_v20 = vpop.f32.mrb[14].mxu0  ;;  %v4297_v17 = vld [vmem:[#allocation7 + $0xc0] ss:$16 sps:$4 sm:$0xff]   ;;  %v4300_v18 = vld [vmem:[#allocation7 + $0xc8] ss:$16 sps:$4 sm:$0xff]   ;;  %1339 = vmatprep.subr.bf16.mxu1 %v4299_v15 }
 0x5e1   :  { %v4070_v22 = vpop.f32.mrb[15].mxu0  ;;  %v4305_v19 = vld [vmem:[#allocation7 + $0xe4] ss:$16 sps:$4 sm:$0xff]   ;;  %v4308_v20 = vld [vmem:[#allocation7 + $0xec] ss:$16 sps:$4 sm:$0xff]   ;;  %1340 = vmatpush1.bf16.msra.mxu1 %v4297_v17 }
 0x5e2   :  { %v4306_v22 = vld [vmem:[#allocation7 + $0xe8] ss:$16 sps:$4 sm:$0xff]   ;;  %1341 = vmatprep.subr.bf16.mxu1 %v4305_v19 }
 0x5e5   :  { %1342 = vmatpush1.bf16.msra.mxu1 %v4303_v21 }
 0x612   :  { %v957_v27 = vpop.f32.mrb[12].mxu1 }
 0x613   :  { %972 = vrot.lane.b32.xlu0 %v957_v27, %s4710_s1  ;;  %v4075_v28 = vpop.f32.mrb[13].mxu1  ;;  %v5004_v27 = vsub.s32 3, %v4881_v42 }
 0x614   :  { %v960_v29 = vpop.f32.mrb[14].mxu1  ;;  %v1105_v28 = vrot.slane %v4998_v38, %v4903_v58 }
 0x615   :  { %v4076_v30 = vpop.f32.mrb[15].mxu1  ;;  %v1162_v13 = vrot.slane %v1145_v9, %v5004_v27 }
 0x650   :  { %v965_v31 = vpop.permute.xlu0 %964 }
 0x651   :  { %v975_v32 = vsel %vm428_vm1, %v819_v6, %v965_v31  ;;  %v969_v33 = vpop.permute.xlu1 %968  ;;  %v4282_v6 = vld [vmem:[#allocation7 + $0x68] ss:$16 sps:$4 sm:$0xff]   ;;  %v1110_v31 = vrot.slane %v4998_v38, %v5004_v27 }
 0x652   :  { %v977_v34 = vsel %vm976_vm4, %v975_v32, %v969_v33 }
 0x685   :  { %v973_v35 = vpop.permute.xlu0 %972 }
 0x686   :  { %v979_v36 = vsel %vm978_vm5, %v977_v34, %v973_v35  ;;  %v4309_v35 = vld [vmem:[#allocation10 + $0x40] sm:$0xff]  }
 0x687   :  { %v981_v37 = vpack.c.bf16 %v979_v36, %v979_v36  ;;  %v4310_v36 = vld [vmem:[#allocation10 + $0xc0] sm:$0xff]   ;;  %3882 = vmatprep.subr.bf16.mxu1 %v4309_v35 }
 0x689   :  { %4094 = vmatmul.mubr.bf16.vlgmr.msra.gmra.mrb[16].mxu0 %v981_v37  ;;  %v4311_v37 = vld [vmem:[#allocation10] sm:$0xff]  }
 0x68a   :  { %1400 = vmatprep.mubr.bf16.mxu0 %v4708_v25  ;;  %1369 = vmatpush1.bf16.msra.mxu0 %v4264_v52  ;;  %v4321_v52 = vld [vmem:[#allocation10 + $0x58] sm:$0xff]  }
 0x68b   :  { %1370 = vmatprep.subr.bf16.mxu0 %v4272_v55  ;;  %v4324_v55 = vld [vmem:[#allocation10 + $0x98] sm:$0xff]  }
 0x68e   :  { %1371 = vmatpush1.bf16.msra.mxu0 %v4270_v57  ;;  %v4326_v57 = vld [vmem:[#allocation10 + $0xe0] sm:$0xff]  }
 0x68f   :  { %1372 = vmatprep.subr.bf16.mxu0 %v4278_v60  ;;  %v4328_v60 = vld [vmem:[#allocation10 + $0xa0] sm:$0xff]  }
 0x75c   :  { %v1084_v41 = vpop.f32.mrb[16].mxu0 }
 0x75d   :  { %v1085_v44 = vadd.f32 %v1084_v41, %v1001_v40  ;;  %v4095_v46 = vpop.f32.mrb[17].mxu0  ;;  %v4312_v40 = vld [vmem:[#allocation10 + $0x80] sm:$0xff]   ;;  %v4313_v41 = vld [vmem:[#allocation10 + $0x48] sm:$0xff]  }
 0x75e   :  { %v1087_v47 = vpop.f32.mrb[18].mxu0  ;;  %v4315_v46 = vld [vmem:[#allocation10 + $0x8] sm:$0xff]  }
 0x75f   :  { %v4096_v48 = vpop.f32.mrb[19].mxu0  ;;  %v1090_v49 = vadd.f32 %v1085_v44, %v4873_v39  ;;  %v4276_v39 = vld [vmem:[#allocation7 + $0x48] ss:$16 sps:$4 sm:$0xff]   ;;  %v4314_v44 = vld [vmem:[#allocation10 + $0xc8] sm:$0xff]  }
 0x760   :  { %1373 = vmatpush1.bf16.msra.mxu0 %v4276_v39  ;;  %v4316_v47 = vld [vmem:[#allocation10 + $0x88] sm:$0xff]   ;;  %v4317_v48 = vld [vmem:[#allocation10 + $0x50] sm:$0xff]  }
 0x761   :  { %1091 = vadd.xlane.f32.xlu1 %v1090_v49  ;;  %1374 = vmatprep.subr.bf16.mxu0 %v4284_v4  ;;  %v4330_v39 = vld [vmem:[#allocation10 + $0xe8] sm:$0xff]   ;;  %v4336_v4 = vld [vmem:[#allocation10 + $0xb0] sm:$0xff]  }
 0x764   :  { %1375 = vmatpush1.bf16.msra.mxu0 %v4282_v6  ;;  %v4338_v6 = vld [vmem:[#allocation10 + $0xf8] sm:$0xff]  }
 0x765   :  { %1376 = vmatprep.subr.bf16.mxu0 %v4290_v8  ;;  %v4340_v8 = vld [vmem:[#allocation10 + $0xb8] sm:$0xff]  }
 0x768   :  { %1377 = vmatpush1.bf16.msra.mxu0 %v4288_v10  ;;  %v1150_v10 = vrot.slane %v1145_v9, %v4884_v43 }
 0x769   :  { %1378 = vmatprep.subr.bf16.mxu0 %v4296_v12  ;;  %v1154_v12 = vrot.slane %v1145_v9, %v4887_v45 }
 0x76c   :  { %1379 = vmatpush1.bf16.msra.mxu0 %v4294_v14 }
 0x76d   :  { %1380 = vmatprep.subr.bf16.mxu0 %v4302_v16 }
 0x770   :  { %1381 = vmatpush1.bf16.msra.mxu0 %v4300_v18 }
 0x771   :  { %1382 = vmatprep.subr.bf16.mxu0 %v4308_v20 }
 0x774   :  { %1383 = vmatpush1.bf16.msra.mxu0 %v4306_v22 }
 0x775   :  { %3904 = vmatprep.subr.bf16.mxu0 %v4310_v36 }
 0x7ee   :  { %v1092_v62 = vpop.xlane.xlu1 %1091 }
 0x7ef   :  { %v1093_v63 = vmul.f32 0.0078125, %v1092_v62  ;;  %v4331_v62 = vld [vmem:[#allocation10 + $0x28] sm:$0xff]  }
 0x7f1   :  { %v1094_v0 = vsub.f32 %v1090_v49, %v1093_v63  ;;  %v4318_v49 = vld [vmem:[#allocation10 + $0xd0] sm:$0xff]   ;;  %v4332_v63 = vld [vmem:[#allocation10 + $0xa8] sm:$0xff]  }
 0x7f3   :  { %v1095_v1 = vmul.f32 %v1094_v0, %v1094_v0 }
 0x7f5   :  { %1096 = vadd.xlane.f32.xlu0 %v1095_v1  ;;  %v4334_v1 = vld [vmem:[#allocation10 + $0xf0] sm:$0xff]  }
 0x882   :  { %v1097_v23 = vpop.xlane.xlu0 %1096 }
 0x883   :  { %v1098_v24 = vmul.f32 0.0078125, %v1097_v23 }
 0x885   :  { %v1099_v26 = vadd.f32 1e-12, %v1098_v24 }
 0x887   :  { %4487 = vrsqrt.f32 %v1099_v26 }
 0x891   :  { %v4488_v29 = vpop.eup %4487 }
 0x892   :  { %v1101_v30 = vmul.f32 %v4488_v29, %v1094_v0  ;;  %v4333_v0 = vld [vmem:[#allocation10 + $0x70] sm:$0xff]  }
 0x894   :  { %v1106_v32 = vmul.f32 %v1105_v28, %v1101_v30 }
 0x896   :  { %v5010_v33 = vadd.f32 %v1110_v31, %v1106_v32 }
 0x898   :  { %v1112_v34 = vpack.c.bf16 %v5010_v33, %v5010_v33 }
 0x89a   :  { %1360 = vmatmul.mubr.bf16.vlgmr.msra.gmra.mrb[16].mxu1 %v1112_v34  ;;  %1401 = vmatmul.mubr.bf16.vlgmr.msra.gmra.mrb[20].mxu0 %v1112_v34 }
 0x89b   :  { %3883 = vmatpush3.bf16.msra.mxu1 %v4311_v37  ;;  %3905 = vmatpush3.bf16.msra.mxu0 %v4312_v40 }
 0x89c   :  { %3884 = vmatprep.subr.bf16.mxu1 %v4313_v41  ;;  %3906 = vmatprep.subr.bf16.mxu0 %v4314_v44 }
 0x89f   :  { %3885 = vmatpush3.bf16.msra.mxu1 %v4315_v46  ;;  %3907 = vmatpush3.bf16.msra.mxu0 %v4316_v47 }
 0x8a0   :  { %3886 = vmatprep.subr.bf16.mxu1 %v4317_v48  ;;  %3908 = vmatprep.subr.bf16.mxu0 %v4318_v49 }
 0x8a3   :  { %3887 = vmatpush3.bf16.msra.mxu1 %v4319_v50  ;;  %3909 = vmatpush3.bf16.msra.mxu0 %v4320_v51 }
 0x8a4   :  { %3888 = vmatprep.subr.bf16.mxu1 %v4321_v52  ;;  %3910 = vmatprep.subr.bf16.mxu0 %v4322_v53 }
 0x8a7   :  { %3889 = vmatpush3.bf16.msra.mxu1 %v4323_v54  ;;  %3911 = vmatpush3.bf16.msra.mxu0 %v4324_v55 }
 0x8a8   :  { %3890 = vmatprep.subr.bf16.mxu1 %v4325_v56  ;;  %3912 = vmatprep.subr.bf16.mxu0 %v4326_v57 }
 0x8ab   :  { %3891 = vmatpush3.bf16.msra.mxu1 %v4327_v59  ;;  %3913 = vmatpush3.bf16.msra.mxu0 %v4328_v60 }
 0x8ac   :  { %3892 = vmatprep.subr.bf16.mxu1 %v4329_v61  ;;  %3914 = vmatprep.subr.bf16.mxu0 %v4330_v39 }
 0x8af   :  { %3893 = vmatpush3.bf16.msra.mxu1 %v4331_v62  ;;  %3915 = vmatpush3.bf16.msra.mxu0 %v4332_v63 }
 0x8b0   :  { %3894 = vmatprep.subr.bf16.mxu1 %v4333_v0  ;;  %3916 = vmatprep.subr.bf16.mxu0 %v4334_v1 }
 0x8b3   :  { %3895 = vmatpush3.bf16.msra.mxu1 %v4335_v2  ;;  %3917 = vmatpush3.bf16.msra.mxu0 %v4336_v4 }
 0x8b4   :  { %3896 = vmatprep.subr.bf16.mxu1 %v4337_v5  ;;  %3918 = vmatprep.subr.bf16.mxu0 %v4338_v6 }
 0x8b7   :  { %3897 = vmatpush3.bf16.msra.mxu1 %v4339_v7  ;;  %3919 = vmatpush3.bf16.msra.mxu0 %v4340_v8 }
 0x8b8   :  { %4097 = vmatprep.subr.bf16.mxu0 %v4707_v3 }
 0x96d   :  { %v1361_v14 = vpop.f32.mrb[16].mxu1  ;;  %v1402_v15 = vpop.f32.mrb[20].mxu0 }
 0x96e   :  { %v1362_v16 = vadd.f32 %v1361_v14, %v1150_v10  ;;  %v1403_v17 = vadd.f32 %v1402_v15, %v1158_v11  ;;  %v1363_v18 = vpop.f32.mrb[17].mxu1  ;;  %v1404_v19 = vpop.f32.mrb[21].mxu0 }
 0x96f   :  { %v1364_v20 = vadd.f32 %v1363_v18, %v1154_v12  ;;  %v1405_v21 = vadd.f32 %v1404_v19, %v1162_v13  ;;  %v1365_v22 = vpop.f32.mrb[18].mxu1  ;;  %v1406_v23 = vpop.f32.mrb[22].mxu0  ;;  %v1516_v12 = vrot.slane %v4998_v38, %v4887_v45 }
 0x970   :  { %v1409_v24 = vmul.f32 %v1362_v16, %v1362_v16  ;;  %v1411_v26 = vmul.f32 %v1403_v17, %v1403_v17  ;;  %v1366_v28 = vpop.f32.mrb[19].mxu1  ;;  %v1407_v29 = vpop.f32.mrb[23].mxu0 }
 0x971   :  { %v1410_v30 = vmul.f32 %v1364_v20, %v1364_v20  ;;  %v1412_v31 = vmul.f32 %v1405_v21, %v1405_v21  ;;  %v4343_v28 = vld [vmem:[#allocation2 + $0xc4] ss:$12 sps:$4 sm:$0xff]   ;;  %v4344_v29 = vld [vmem:[#allocation2 + $0xc8] ss:$12 sps:$4 sm:$0xff]  }
 0x972   :  { %v1413_v32 = vmul.f32 %v1409_v24, %v1362_v16  ;;  %v1415_v34 = vmul.f32 %v1411_v26, %v1403_v17  ;;  %v4341_v26 = vld [vmem:[#allocation2 + $0xc0] ss:$12 sps:$4 sm:$0xff]   ;;  %1991 = vmatprep.subr.bf16.mxu1 %v4343_v28 }
 0x973   :  { %v1414_v35 = vmul.f32 %v1410_v30, %v1364_v20  ;;  %v1416_v36 = vmul.f32 %v1412_v31, %v1405_v21  ;;  %v4347_v30 = vld [vmem:[#allocation2 + $0xdc] ss:$12 sps:$4 sm:$0xff]   ;;  %v4348_v31 = vld [vmem:[#allocation2 + $0xe0] ss:$12 sps:$4 sm:$0xff]  }
 0x974   :  { %v1417_v37 = vmul.f32 0.044715, %v1413_v32  ;;  %v1419_v40 = vmul.f32 0.044715, %v1415_v34  ;;  %v4345_v32 = vld [vmem:[#allocation2 + $0xd8] ss:$12 sps:$4 sm:$0xff]  }
 0x975   :  { %v1418_v41 = vmul.f32 0.044715, %v1414_v35  ;;  %v1420_v44 = vmul.f32 0.044715, %v1416_v36  ;;  %v4351_v34 = vld [vmem:[#allocation2 + $0xf4] ss:$12 sps:$4 sm:$0xff]  }
 0x976   :  { %v1421_v46 = vadd.f32 %v1417_v37, %v1362_v16  ;;  %v1423_v47 = vadd.f32 %v1419_v40, %v1403_v17  ;;  %v4349_v35 = vld [vmem:[#allocation2 + $0xf0] ss:$12 sps:$4 sm:$0xff]  }
 0x977   :  { %v1422_v48 = vadd.f32 %v1418_v41, %v1364_v20  ;;  %v1424_v49 = vadd.f32 %v1420_v44, %v1405_v21  ;;  %v4352_v41 = vld [vmem:[#allocation2 + $0xf8] ss:$12 sps:$4 sm:$0xff]  }
 0x978   :  { %v1425_v50 = vmul.f32 0.7978846, %v1421_v46  ;;  %v1427_v51 = vmul.f32 0.7978846, %v1423_v47  ;;  %v4355_v44 = vld [vmem:[#allocation2 + $0x10c] ss:$12 sps:$4 sm:$0xff]  }
 0x979   :  { %v1426_v52 = vmul.f32 0.7978846, %v1422_v48  ;;  %v1428_v53 = vmul.f32 0.7978846, %v1424_v49  ;;  %v4353_v46 = vld [vmem:[#allocation2 + $0x108] ss:$12 sps:$4 sm:$0xff]  }
 0x97a   :  { %4489 = vtanh.f32 %v1425_v50  ;;  %v4356_v47 = vld [vmem:[#allocation2 + $0x110] ss:$12 sps:$4 sm:$0xff]   ;;  %v4357_v49 = vld [vmem:[#allocation2 + $0x120] ss:$12 sps:$4 sm:$0xff]   ;;  %v4360_v50 = vld [vmem:[#allocation2 + $0x128] ss:$12 sps:$4 sm:$0xff]  }
 0x97b   :  { %4491 = vtanh.f32 %v1427_v51  ;;  %v4359_v48 = vld [vmem:[#allocation2 + $0x124] ss:$12 sps:$4 sm:$0xff]   ;;  %v4363_v51 = vld [vmem:[#allocation2 + $0x13c] ss:$12 sps:$4 sm:$0xff]  }
 0x97c   :  { %4493 = vtanh.f32 %v1426_v52  ;;  %v4361_v52 = vld [vmem:[#allocation2 + $0x138] ss:$12 sps:$4 sm:$0xff]  }
 0x97d   :  { %4495 = vtanh.f32 %v1428_v53  ;;  %v4364_v53 = vld [vmem:[#allocation2 + $0x140] ss:$12 sps:$4 sm:$0xff]  }
 0x984   :  { %v4490_v54 = vpop.eup %4489 }
 0x985   :  { %v4492_v55 = vpop.eup %4491  ;;  %v1433_v56 = vadd.f32 1.0, %v4490_v54  ;;  %v4367_v54 = vld [vmem:[#allocation2 + $0x154] ss:$12 sps:$4 sm:$0xff]  }
 0x986   :  { %v4494_v57 = vpop.eup %4493  ;;  %v1435_v59 = vadd.f32 1.0, %v4492_v55  ;;  %v4365_v55 = vld [vmem:[#allocation2 + $0x150] ss:$12 sps:$4 sm:$0xff]  }
 0x987   :  { %v4496_v60 = vpop.eup %4495  ;;  %v1434_v61 = vadd.f32 1.0, %v4494_v57  ;;  %v1437_v39 = vmul.f32 0.5, %v1433_v56  ;;  %v4368_v56 = vld [vmem:[#allocation2 + $0x158] ss:$12 sps:$4 sm:$0xff]  }
 0x988   :  { %v1436_v62 = vadd.f32 1.0, %v4496_v60  ;;  %v1439_v63 = vmul.f32 0.5, %v1435_v59  ;;  %v4371_v57 = vld [vmem:[#allocation2 + $0x16c] ss:$12 sps:$4 sm:$0xff]   ;;  %v4369_v59 = vld [vmem:[#allocation2 + $0x168] ss:$12 sps:$4 sm:$0xff]  }
 0x989   :  { %v1438_v0 = vmul.f32 0.5, %v1434_v61  ;;  %v1441_v2 = vmul.f32 %v1437_v39, %v1362_v16  ;;  %v4372_v60 = vld [vmem:[#allocation2 + $0x170] ss:$12 sps:$4 sm:$0xff]  }
 0x98a   :  { %v1440_v1 = vmul.f32 0.5, %v1436_v62  ;;  %v1443_v5 = vmul.f32 %v1439_v63, %v1403_v17  ;;  %v1803_v63 = vsub.s32 4, %v4881_v42 }
 0x98b   :  { %v1442_v4 = vmul.f32 %v1438_v0, %v1364_v20  ;;  %v1445_v9 = vpack.c.bf16 %v1441_v2, %v1441_v2  ;;  %v1808_v0 = vsub.s32 5, %v4881_v42 }
 0x98c   :  { %v1444_v6 = vmul.f32 %v1440_v1, %v1405_v21  ;;  %v1447_v10 = vpack.c.bf16 %v1443_v5, %v1443_v5  ;;  %v1804_v1 = vrot.slane %v4998_v38, %v1803_v63 }
 0x98d   :  { %v1446_v7 = vpack.c.bf16 %v1442_v4, %v1442_v4  ;;  %v1809_v5 = vrot.slane %v4998_v38, %v1808_v0 }
 0x98e   :  { %v1448_v8 = vpack.c.bf16 %v1444_v6, %v1444_v6 }
 0x98f   :  { %1741 = vmatprep.mubr.bf16.mxu1 %v1446_v7 }
 0x990   :  { %1781 = vmatprep.mubr.bf16.mxu0 %v1448_v8  ;;  %1742 = vmatmul.mubr.bf16.vlgmr.msra.gmra.mrb[20].mxu1 %v1445_v9  ;;  %v1846_v9 = vld [vmem:[#allocation5 + $0x3] sm:$0x7] }
 0x991   :  { %1782 = vmatmul.mubr.bf16.vlgmr.msra.gmra.mrb[24].mxu0 %v1447_v10  ;;  %2023 = vmatprep.mubr.bf16.mxu1 %v4708_v25  ;;  %v1851_v10 = vrot.slane %v1846_v9, %v4884_v43 }
 0x992   :  { %4113 = vmatprep.mubr.msk.bf16.mxu0 %vm4709_vm0, %v4707_v3  ;;  %4098 = vmatpush3.bf16.msra.mxu0 %v4344_v29 }
 0x993   :  { %1992 = vmatpush1.bf16.msra.mxu1 %v4341_v26  ;;  %4099 = vmatprep.subr.bf16.mxu0 %v4707_v3 }
 0x994   :  { %1993 = vmatprep.subr.bf16.mxu1 %v4347_v30 }
 0x996   :  { %4100 = vmatpush3.bf16.msra.mxu0 %v4348_v31 }
 0x997   :  { %1994 = vmatpush1.bf16.msra.mxu1 %v4345_v32  ;;  %4101 = vmatprep.subr.bf16.mxu0 %v4707_v3 }
 0x998   :  { %1995 = vmatprep.subr.bf16.mxu1 %v4351_v34 }
 0x99a   :  { %4102 = vmatpush3.bf16.msra.mxu0 %v4352_v41 }
 0x99b   :  { %1996 = vmatpush1.bf16.msra.mxu1 %v4349_v35  ;;  %4103 = vmatprep.subr.bf16.mxu0 %v4707_v3 }
 0x99c   :  { %1997 = vmatprep.subr.bf16.mxu1 %v4355_v44 }
 0x99e   :  { %4104 = vmatpush3.bf16.msra.mxu0 %v4356_v47 }
 0x99f   :  { %1998 = vmatpush1.bf16.msra.mxu1 %v4353_v46  ;;  %4105 = vmatprep.subr.bf16.mxu0 %v4707_v3 }
 0x9a0   :  { %1999 = vmatprep.subr.bf16.mxu1 %v4359_v48 }
 0x9a2   :  { %4106 = vmatpush3.bf16.msra.mxu0 %v4360_v50 }
 0x9a3   :  { %2000 = vmatpush1.bf16.msra.mxu1 %v4357_v49  ;;  %4107 = vmatprep.subr.bf16.mxu0 %v4707_v3 }
 0x9a4   :  { %2001 = vmatprep.subr.bf16.mxu1 %v4363_v51 }
 0x9a6   :  { %4108 = vmatpush3.bf16.msra.mxu0 %v4364_v53 }
 0x9a7   :  { %2002 = vmatpush1.bf16.msra.mxu1 %v4361_v52  ;;  %4109 = vmatprep.subr.bf16.mxu0 %v4707_v3 }
 0x9a8   :  { %2003 = vmatprep.subr.bf16.mxu1 %v4367_v54 }
 0x9aa   :  { %4110 = vmatpush3.bf16.msra.mxu0 %v4368_v56 }
 0x9ab   :  { %2004 = vmatpush1.bf16.msra.mxu1 %v4365_v55  ;;  %4111 = vmatprep.subr.bf16.mxu0 %v4707_v3 }
 0x9ac   :  { %2005 = vmatprep.subr.bf16.mxu1 %v4371_v57 }
 0x9ae   :  { %4112 = vmatpush3.bf16.msra.mxu0 %v4372_v60 }
 0x9af   :  { %2006 = vmatpush1.bf16.msra.mxu1 %v4369_v59  ;;  %4149 = vmatprep.subr.bf16.mxu0 %v4707_v3 }
 0x9b0   :  { %4117 = vmatprep.subr.mxu1 %v4707_v3 }
 0xa63   :  { %v3898_v11 = vpop.f32.mrb[20].mxu1 }
 0xa64   :  { %v3920_v13 = vpop.f32.mrb[24].mxu0  ;;  %v3899_v14 = vpop.f32.mrb[21].mxu1 }
 0xa65   :  { %v3900_v15 = vadd.f32 %v3899_v14, %v3898_v11  ;;  %v3921_v16 = vpop.f32.mrb[25].mxu0  ;;  %v3901_v17 = vpop.f32.mrb[22].mxu1  ;;  %v1855_v11 = vrot.slane %v1846_v9, %v4887_v45 }
 0xa66   :  { %v3922_v18 = vadd.f32 %v3921_v16, %v3920_v13  ;;  %v3923_v19 = vpop.f32.mrb[26].mxu0  ;;  %v3902_v20 = vpop.f32.mrb[23].mxu1 }
 0xa67   :  { %v1744_v21 = vadd.f32 %v3900_v15, %v1516_v12  ;;  %v3924_v22 = vpop.f32.mrb[27].mxu0 }
 0xa68   :  { %v1859_v22 = vrot.slane %v1846_v9, %v4903_v58 }
 0xa69   :  { %v1784_v23 = vadd.f32 %v3922_v18, %v1744_v21 }
 0xa6b   :  { %v1789_v24 = vadd.f32 %v1784_v23, %v5010_v33 }
 0xa6d   :  { %1790 = vadd.xlane.f32.xlu0 %v1789_v24 }
 0xafa   :  { %v1791_v33 = vpop.xlane.xlu0 %1790 }
 0xafb   :  { %v1792_v36 = vmul.f32 0.0078125, %v1791_v33 }
 0xafd   :  { %v1793_v37 = vsub.f32 %v1789_v24, %v1792_v36 }
 0xaff   :  { %v1794_v40 = vmul.f32 %v1793_v37, %v1793_v37 }
 0xb01   :  { %1795 = vadd.xlane.f32.xlu1 %v1794_v40 }
 0xb8e   :  { %v1796_v61 = vpop.xlane.xlu1 %1795 }
 0xb8f   :  { %v1797_v39 = vmul.f32 0.0078125, %v1796_v61 }
 0xb91   :  { %v1798_v62 = vadd.f32 1e-12, %v1797_v39 }
 0xb93   :  { %4497 = vrsqrt.f32 %v1798_v62 }
 0xb9d   :  { %v4498_v2 = vpop.eup %4497 }
 0xb9e   :  { %v1800_v4 = vmul.f32 %v4498_v2, %v1793_v37 }
 0xba0   :  { %v1805_v6 = vmul.f32 %v1804_v1, %v1800_v4 }
 0xba2   :  { %v5042_v7 = vadd.f32 %v1809_v5, %v1805_v6 }
 0xba4   :  { %v1811_v8 = vpack.c.bf16 %v5042_v7, %v5042_v7 }
 0xba6   :  { %2024 = vmatmul.mubr.bf16.vlgmr.msra.gmra.mrb[24].mxu1 %v1811_v8  ;;  %4114 = vmatmul.mubr.bf16.vlgmr.msra.gmra.mrb[28].mxu0 %v1811_v8 }
 0xba7   :  { %4119 = vmatprep.mubr.msk.f32.mxu1 %vm4709_vm0, %v4707_v3  ;;  %4151 = vmatprep.mubr.msk.bf16.mxu0 %vm4709_vm0, %v4707_v3 }
 0xc79   :  { %v2025_v38 = vpop.f32.mrb[24].mxu1  ;;  %v2066_v12 = vpop.f32.mrb[28].mxu0 }
 0xc7a   :  { %v2026_v13 = vadd.f32 %v2025_v38, %v1851_v10  ;;  %v2027_v14 = vpop.f32.mrb[25].mxu1  ;;  %v4115_v15 = vpop.f32.mrb[29].mxu0  ;;  %v5066_v26 = vadd.f32 %v2066_v12, %v1859_v22 }
 0xc7b   :  { %v2028_v16 = vadd.f32 %v2027_v14, %v1855_v11  ;;  %v2029_v17 = vpop.f32.mrb[26].mxu1  ;;  %v2069_v18 = vpop.f32.mrb[30].mxu0 }
 0xc7c   :  { %v2030_v19 = vpop.f32.mrb[27].mxu1  ;;  %v4116_v20 = vpop.f32.mrb[31].mxu0  ;;  %2073 = vrot.lane.b32.xlu1 %v2026_v13, %s4710_s1  ;;  %v2440_v30 = vpack.c.bf16 %v5066_v26, %v5066_v26 }
 0xc7d   :  { %2080 = vrot.lane.b32.xlu0 %v2028_v16, %s4710_s1  ;;  %4118 = vmatpush3.xpose.msk.msra.mxu1 %vm428_vm1, %v2028_v16 }
 0xc7e   :  { %4122 = vmatprep.subr.mxu1 %v4707_v3  ;;  %v2448_v32 = vsel %vm781_vm2, %v2440_v30, 0 }
 0xc80   :  { %2082 = vrot.lane.b32.xlu1 %v2028_v16, %s4697_s3  ;;  %4120 = vmatmul.mubr.msk.f32.vlgmr.msra.gmra.mrb[28].mxu1 %vm428_vm1, %v2026_v13 }
 0xc81   :  { %2075 = vrot.lane.b32.xlu0 %v2026_v13, %s4697_s3  ;;  %4124 = vmatprep.mubr.msk.f32.mxu1 %vm4709_vm0, %v4707_v3 }
 0xc84   :  { %2084 = vrot.lane.b32.xlu1 %v2028_v16, %s4711_s20 }
 0xc85   :  { %2077 = vrot.lane.b32.xlu0 %v2026_v13, %s4711_s20 }
 0xcee   :  { %v2074_v21 = vpop.permute.xlu1 %2073 }
 0xcef   :  { %v2081_v23 = vpop.permute.xlu0 %2080 }
 0xcf0   :  { %4123 = vmatpush3.xpose.msk.msra.mxu1 %vm428_vm1, %v2081_v23 }
 0xcf1   :  { %4127 = vmatprep.subr.mxu1 %v4707_v3 }
 0xcf2   :  { %v2083_v24 = vpop.permute.xlu1 %2082 }
 0xcf3   :  { %4125 = vmatmul.mubr.msk.f32.vlgmr.msra.gmra.mrb[30].mxu1 %vm428_vm1, %v2074_v21  ;;  %v2076_v28 = vpop.permute.xlu0 %2075 }
 0xcf4   :  { %4128 = vmatpush3.xpose.msk.msra.mxu1 %vm428_vm1, %v2083_v24  ;;  %4129 = vmatprep.mubr.msk.f32.mxu1 %vm4709_vm0, %v4707_v3 }
 0xcf5   :  { %4132 = vmatprep.subr.mxu1 %v4707_v3 }
 0xcf6   :  { %v2085_v29 = vpop.permute.xlu1 %2084 }
 0xcf7   :  { %4130 = vmatmul.mubr.msk.f32.vlgmr.msra.gmra.mrb[32].mxu1 %vm428_vm1, %v2076_v28  ;;  %v2078_v31 = vpop.permute.xlu0 %2077 }
 0xcf8   :  { %4133 = vmatpush3.xpose.msk.msra.mxu1 %vm428_vm1, %v2085_v29  ;;  %4134 = vmatprep.mubr.msk.f32.mxu1 %vm4709_vm0, %v4707_v3 }
 0xcf9   :  { %4137 = vmatprep.subr.bf16.mxu1 %v4707_v3 }
 0xcfb   :  { %4135 = vmatmul.mubr.msk.f32.vlgmr.msra.gmra.mrb[34].mxu1 %vm428_vm1, %v2078_v31 }
 0xcfc   :  { %4138 = vmatpush3.bf16.msra.mxu1 %v2448_v32  ;;  %4139 = vmatprep.mubr.msk.bf16.mxu1 %vm4709_vm0, %v4707_v3 }
 0xcfd   :  { %4143 = vmatprep.subr.bf16.mxu1 %v4707_v3 }
 0xd53   :  { %v2166_v34 = vpop.f32.mrb[28].mxu1 }
 0xd54   :  { %v4121_v35 = vpop.f32.mrb[29].mxu1  ;;  %v2392_v33 = vsel %vm725_vm3, %v2166_v34, -inf }
 0xd55   :  { %2393 = vmax.xlane.f32.xlu1 %v2392_v33 }
 0xdc6   :  { %v2240_v36 = vpop.f32.mrb[30].mxu1 }
 0xdc7   :  { %v4126_v37 = vpop.f32.mrb[31].mxu1  ;;  %v2395_v40 = vsel %vm725_vm3, %v2240_v36, -inf }
 0xdc8   :  { %2396 = vmax.xlane.f32.xlu0 %v2395_v40 }
 0xdca   :  { %v2314_v41 = vpop.f32.mrb[32].mxu1 }
 0xdcb   :  { %v4131_v44 = vpop.f32.mrb[33].mxu1  ;;  %v2398_v46 = vsel %vm725_vm3, %v2314_v41, -inf }
 0xdcc   :  { %2399 = vmax.xlane.f32.xlu0 %v2398_v46  ;;  %v4373_v44 = vld [vmem:[%s5232_s4 + $0x40] sm:$0xff]   ;;  %v4374_v46 = vld [vmem:[%s5232_s4 + $0x48] sm:$0xff]  }
 0xdce   :  { %v2388_v47 = vpop.f32.mrb[34].mxu1 }
 0xdcf   :  { %v4136_v48 = vpop.f32.mrb[35].mxu1  ;;  %v2401_v49 = vsel %vm725_vm3, %v2388_v47, -inf }
 0xdd0   :  { %2402 = vmax.xlane.f32.xlu1 %v2401_v49 }
 0xde2   :  { %v2394_v50 = vpop.xlane.xlu1 %2393 }
 0xde3   :  { %v2404_v51 = vsub.f32 %v2166_v34, %v2394_v50 }
 0xde5   :  { %v2408_v52 = vmul.f32 1.442695, %v2404_v51  ;;  %v4376_v51 = vld [vmem:[%s5232_s4 + $0x58] sm:$0xff]  }
 0xde7   :  { %4499 = vpow2.f32 %v2408_v52 }
 0xdf1   :  { %v4500_v53 = vpop.eup %4499 }
 0xdf2   :  { %v2416_v54 = vsel %vm725_vm3, %v4500_v53, 0.0 }
 0xdf3   :  { %2417 = vadd.xlane.f32.xlu0 %v2416_v54 }
 0xe55   :  { %v2397_v55 = vpop.xlane.xlu0 %2396 }
 0xe56   :  { %v2405_v56 = vsub.f32 %v2240_v36, %v2397_v55 }
 0xe58   :  { %v2410_v57 = vmul.f32 1.442695, %v2405_v56  ;;  %v4377_v56 = vld [vmem:[%s5232_s4 + $0x60] sm:$0xff]  }
 0xe59   :  { %v2400_v59 = vpop.xlane.xlu0 %2399 }
 0xe5a   :  { %4501 = vpow2.f32 %v2410_v57  ;;  %v2406_v60 = vsub.f32 %v2314_v41, %v2400_v59  ;;  %v4378_v59 = vld [vmem:[%s5232_s4 + $0x68] sm:$0xff]  }
 0xe5c   :  { %v2412_v61 = vmul.f32 1.442695, %v2406_v60  ;;  %v4379_v60 = vld [vmem:[%s5232_s4 + $0x70] sm:$0xff]  }
 0xe5d   :  { %v2403_v5 = vpop.xlane.xlu1 %2402 }
 0xe5e   :  { %4503 = vpow2.f32 %v2412_v61  ;;  %v2407_v6 = vsub.f32 %v2388_v47, %v2403_v5  ;;  %v4375_v47 = vld [vmem:[%s5232_s4 + $0x50] sm:$0xff]   ;;  %v4380_v61 = vld [vmem:[%s5232_s4 + $0x78] sm:$0xff]  }
 0xe60   :  { %v2414_v8 = vmul.f32 1.442695, %v2407_v6 }
 0xe64   :  { %v4502_v39 = vpop.eup %4501 }
 0xe65   :  { %v2419_v62 = vsel %vm725_vm3, %v4502_v39, 0.0 }
 0xe66   :  { %2420 = vadd.xlane.f32.xlu1 %v2419_v62 }
 0xe68   :  { %v4504_v1 = vpop.eup %4503 }
 0xe69   :  { %v2422_v2 = vsel %vm725_vm3, %v4504_v1, 0.0 }
 0xe6a   :  { %2423 = vadd.xlane.f32.xlu0 %v2422_v2 }
 0xe77   :  { %2090 = vrot.lane.b32.xlu1 %v5066_v26, %s4697_s3 }
 0xe80   :  { %2087 = vrot.lane.b32.xlu0 %v5066_v26, %s4710_s1  ;;  %v2418_v4 = vpop.xlane.xlu0 %2417 }
 0xe81   :  { %4505 = vrcp.f32 %v2418_v4 }
 0xe82   :  { %4507 = vpow2.f32 %v2414_v8 }
 0xe8b   :  { %v4506_v9 = vpop.eup %4505 }
 0xe8c   :  { %v2432_v10 = vmul.f32 %v4506_v9, %v4500_v53  ;;  %v4508_v38 = vpop.eup %4507 }
 0xe8d   :  { %v2425_v12 = vsel %vm725_vm3, %v4508_v38, 0.0 }
 0xe8e   :  { %v2436_v11 = vpack.c.bf16 %v2432_v10, %v2432_v10 }
 0xe90   :  { %4140 = vmatmul.mubr.msk.bf16.vlgmr.msra.gmra.mrb[36].mxu1 %vm725_vm3, %v2436_v11 }
 0xe91   :  { %4145 = vmatprep.mubr.msk.bf16.mxu1 %vm4709_vm0, %v4707_v3 }
 0xe9b   :  { %2426 = vadd.xlane.f32.xlu1 %v2425_v12 }
 0xeac   :  { %2093 = vrot.lane.b32.xlu1 %v5066_v26, %s4711_s20 }
 0xef3   :  { %v2421_v13 = vpop.xlane.xlu1 %2420 }
 0xef4   :  { %4509 = vrcp.f32 %v2421_v13 }
 0xef7   :  { %v2424_v14 = vpop.xlane.xlu0 %2423  ;;  %v2091_v15 = vpop.permute.xlu1 %2090 }
 0xef8   :  { %4511 = vrcp.f32 %v2424_v14  ;;  %v2442_v16 = vpack.c.bf16 %v2091_v15, %v2091_v15 }
 0xefa   :  { %v2540_v17 = vsel %vm781_vm2, %v2442_v16, 0 }
 0xefb   :  { %v2088_v18 = vpop.permute.xlu0 %2087  ;;  %4150 = vmatpush3.bf16.msra.mxu0 %v2540_v17 }
 0xefc   :  { %v2441_v19 = vpack.c.bf16 %v2088_v18, %v2088_v18  ;;  %4161 = vmatprep.subr.bf16.mxu0 %v4707_v3 }
 0xefe   :  { %v4510_v20 = vpop.eup %4509  ;;  %v2494_v21 = vsel %vm781_vm2, %v2441_v19, 0  ;;  %v4381_v19 = vld [vmem:[#allocation7 + $0x100] ss:$16 sps:$4 sm:$0xff]  }
 0xeff   :  { %v2433_v22 = vmul.f32 %v4510_v20, %v4502_v39  ;;  %4144 = vmatpush3.bf16.msra.mxu1 %v2494_v21  ;;  %v4383_v20 = vld [vmem:[#allocation7 + $0x104] ss:$16 sps:$4 sm:$0xff]   ;;  %v4384_v21 = vld [vmem:[#allocation7 + $0x108] ss:$16 sps:$4 sm:$0xff]  }
 0xf00   :  { %4155 = vmatprep.subr.bf16.mxu1 %v4707_v3 }
 0xf01   :  { %v2437_v23 = vpack.c.bf16 %v2433_v22, %v2433_v22  ;;  %v4389_v22 = vld [vmem:[#allocation7 + $0x124] ss:$16 sps:$4 sm:$0xff]  }
 0xf02   :  { %v4512_v24 = vpop.eup %4511 }
 0xf03   :  { %v2434_v26 = vmul.f32 %v4512_v24, %v4504_v1  ;;  %4146 = vmatmul.mubr.msk.bf16.vlgmr.msra.gmra.mrb[40].mxu1 %vm725_vm3, %v2437_v23  ;;  %v4392_v23 = vld [vmem:[#allocation7 + $0x12c] ss:$16 sps:$4 sm:$0xff]   ;;  %v4387_v24 = vld [vmem:[#allocation7 + $0x120] ss:$16 sps:$4 sm:$0xff]  }
 0xf04   :  { %4157 = vmatprep.mubr.msk.bf16.mxu1 %vm4709_vm0, %v4707_v3 }
 0xf05   :  { %v2438_v28 = vpack.c.bf16 %v2434_v26, %v2434_v26  ;;  %v4390_v26 = vld [vmem:[#allocation7 + $0x128] ss:$16 sps:$4 sm:$0xff]  }
 0xf07   :  { %4152 = vmatmul.mubr.msk.bf16.vlgmr.msra.gmra.mrb[32].mxu0 %vm725_vm3, %v2438_v28  ;;  %v4395_v28 = vld [vmem:[#allocation7 + $0x144] ss:$16 sps:$4 sm:$0xff]  }
 0xf08   :  { %4177 = vmatprep.mubr.msk.bf16.mxu0 %vm4709_vm0, %v4707_v3  ;;  %4162 = vmatpush3.bf16.msra.mxu0 %v4373_v44  ;;  %v4410_v44 = vld [vmem:[#allocation7 + $0x18c] ss:$16 sps:$4 sm:$0xff]  }
 0xf09   :  { %4163 = vmatprep.subr.bf16.mxu0 %v4707_v3 }
 0xf0c   :  { %4164 = vmatpush3.bf16.msra.mxu0 %v4374_v46  ;;  %v4405_v46 = vld [vmem:[#allocation7 + $0x180] ss:$16 sps:$4 sm:$0xff]  }
 0xf0d   :  { %4165 = vmatprep.subr.bf16.mxu0 %v4707_v3 }
 0xf10   :  { %4166 = vmatpush3.bf16.msra.mxu0 %v4375_v47  ;;  %v4408_v47 = vld [vmem:[#allocation7 + $0x188] ss:$16 sps:$4 sm:$0xff]  }
 0xf11   :  { %4167 = vmatprep.subr.bf16.mxu0 %v4707_v3 }
 0xf14   :  { %4168 = vmatpush3.bf16.msra.mxu0 %v4376_v51  ;;  %v4414_v51 = vld [vmem:[#allocation7 + $0x1a8] ss:$16 sps:$4 sm:$0xff]  }
 0xf15   :  { %4169 = vmatprep.subr.bf16.mxu0 %v4707_v3 }
 0xf18   :  { %4170 = vmatpush3.bf16.msra.mxu0 %v4377_v56  ;;  %v4425_v56 = vld [vmem:[#allocation7 + $0x1e4] ss:$16 sps:$4 sm:$0xff]  }
 0xf19   :  { %4171 = vmatprep.subr.bf16.mxu0 %v4707_v3 }
 0xf1c   :  { %4172 = vmatpush3.bf16.msra.mxu0 %v4378_v59  ;;  %v4423_v59 = vld [vmem:[#allocation7 + $0x1e0] ss:$16 sps:$4 sm:$0xff]  }
 0xf1d   :  { %4173 = vmatprep.subr.bf16.mxu0 %v4707_v3 }
 0xf20   :  { %4174 = vmatpush3.bf16.msra.mxu0 %v4379_v60  ;;  %v4426_v60 = vld [vmem:[#allocation7 + $0x1e8] ss:$16 sps:$4 sm:$0xff]  }
 0xf21   :  { %4175 = vmatprep.subr.bf16.mxu0 %v4707_v3 }
 0xf24   :  { %4176 = vmatpush3.bf16.msra.mxu0 %v4380_v61 }
 0xf28   :  { %v2427_v29 = vpop.xlane.xlu1 %2426 }
 0xf29   :  { %4513 = vrcp.f32 %v2427_v29  ;;  %v4398_v29 = vld [vmem:[#allocation7 + $0x14c] ss:$16 sps:$4 sm:$0xff]  }
 0xf2c   :  { %v2094_v30 = vpop.permute.xlu1 %2093 }
 0xf2d   :  { %v2443_v31 = vpack.c.bf16 %v2094_v30, %v2094_v30  ;;  %v4393_v30 = vld [vmem:[#allocation7 + $0x140] ss:$16 sps:$4 sm:$0xff]  }
 0xf2f   :  { %v2586_v32 = vsel %vm781_vm2, %v2443_v31, 0 }
 0xf30   :  { %4156 = vmatpush3.bf16.msra.mxu1 %v2586_v32 }
 0xf31   :  { %2994 = vmatprep.subr.bf16.mxu1 %v4383_v20  ;;  %v4439_v20 = vld [vmem:[#allocation10 + $0x110] sm:$0xff]  }
 0xf33   :  { %v4514_v34 = vpop.eup %4513 }
 0xf34   :  { %v2435_v35 = vmul.f32 %v4514_v34, %v4508_v38  ;;  %v5156_v38 = vld [vmem:[%s5236_s8 + $0x8] sm:$0x3f] }
 0xf35   :  { %v2666_v12 = vrot.slane %v5156_v38, %v4884_v43 }
 0xf36   :  { %v2439_v33 = vpack.c.bf16 %v2435_v35, %v2435_v35 }
 0xf38   :  { %4158 = vmatmul.mubr.msk.bf16.vlgmr.msra.gmra.mrb[44].mxu1 %vm725_vm3, %v2439_v33  ;;  %v4401_v33 = vld [vmem:[#allocation7 + $0x164] ss:$16 sps:$4 sm:$0xff]  }
 0xf39   :  { %3026 = vmatprep.mubr.bf16.mxu1 %v4708_v25  ;;  %2995 = vmatpush1.bf16.msra.mxu1 %v4381_v19  ;;  %v4438_v19 = vld [vmem:[#allocation10 + $0x1d0] sm:$0xff]  }
 0xf3a   :  { %2996 = vmatprep.subr.bf16.mxu1 %v4389_v22  ;;  %v4442_v22 = vld [vmem:[#allocation10 + $0x1d8] sm:$0xff]  }
 0xf3d   :  { %2997 = vmatpush1.bf16.msra.mxu1 %v4387_v24  ;;  %v4444_v24 = vld [vmem:[#allocation10 + $0x198] sm:$0xff]  }
 0xf3e   :  { %2998 = vmatprep.subr.bf16.mxu1 %v4395_v28  ;;  %v4446_v28 = vld [vmem:[#allocation10 + $0x1e0] sm:$0xff]  }
 0xf41   :  { %2999 = vmatpush1.bf16.msra.mxu1 %v4393_v30  ;;  %v4448_v30 = vld [vmem:[#allocation10 + $0x1a0] sm:$0xff]  }
 0xf42   :  { %3000 = vmatprep.subr.bf16.mxu1 %v4401_v33  ;;  %v4454_v33 = vld [vmem:[#allocation10 + $0x1f0] sm:$0xff]  }
 0xf63   :  { %v2484_v36 = vpop.f32.mrb[36].mxu1 }
 0xf64   :  { %v4141_v37 = vpop.f32.mrb[37].mxu1 }
 0xf65   :  { %v2487_v40 = vpop.f32.mrb[38].mxu1  ;;  %v4399_v37 = vld [vmem:[#allocation7 + $0x160] ss:$16 sps:$4 sm:$0xff]  }
 0xf66   :  { %v4142_v41 = vpop.f32.mrb[39].mxu1  ;;  %v4402_v40 = vld [vmem:[#allocation7 + $0x168] ss:$16 sps:$4 sm:$0xff]   ;;  %3001 = vmatpush1.bf16.msra.mxu1 %v4399_v37 }
 0xf67   :  { %v4407_v41 = vld [vmem:[#allocation7 + $0x184] ss:$16 sps:$4 sm:$0xff]   ;;  %v4456_v37 = vld [vmem:[#allocation10 + $0x1b0] sm:$0xff]  }
 0xf68   :  { %3002 = vmatprep.subr.bf16.mxu1 %v4407_v41  ;;  %v4458_v41 = vld [vmem:[#allocation10 + $0x1f8] sm:$0xff]  }
 0xf6a   :  { %3003 = vmatpush1.bf16.msra.mxu1 %v4405_v46  ;;  %v4460_v46 = vld [vmem:[#allocation10 + $0x1b8] sm:$0xff]  }
 0xfd6   :  { %v2530_v48 = vpop.f32.mrb[40].mxu1 }
 0xfd7   :  { %2629 = vrot.lane.b32.xlu0 %v2530_v48, %s4711_s20  ;;  %v4147_v49 = vpop.f32.mrb[41].mxu1  ;;  %v4413_v48 = vld [vmem:[#allocation7 + $0x1a4] ss:$16 sps:$4 sm:$0xff]  }
 0xfd8   :  { %v2533_v50 = vpop.f32.mrb[42].mxu1  ;;  %v4416_v49 = vld [vmem:[#allocation7 + $0x1ac] ss:$16 sps:$4 sm:$0xff]   ;;  %3004 = vmatprep.subr.bf16.mxu1 %v4413_v48 }
 0xfd9   :  { %v4148_v52 = vpop.f32.mrb[43].mxu1  ;;  %v4411_v50 = vld [vmem:[#allocation7 + $0x1a0] ss:$16 sps:$4 sm:$0xff]  }
 0xfda   :  { %v2576_v53 = vpop.f32.mrb[32].mxu0  ;;  %3005 = vmatpush1.bf16.msra.mxu1 %v4411_v50  ;;  %v4419_v52 = vld [vmem:[#allocation7 + $0x1c4] ss:$16 sps:$4 sm:$0xff]  }
 0xfdb   :  { %2633 = vrot.lane.b32.xlu1 %v2576_v53, %s4697_s3  ;;  %v4153_v54 = vpop.f32.mrb[33].mxu0  ;;  %v4422_v53 = vld [vmem:[#allocation7 + $0x1cc] ss:$16 sps:$4 sm:$0xff]   ;;  %3006 = vmatprep.subr.bf16.mxu1 %v4419_v52 }
 0xfdc   :  { %v2579_v55 = vpop.f32.mrb[34].mxu0  ;;  %v4417_v54 = vld [vmem:[#allocation7 + $0x1c0] ss:$16 sps:$4 sm:$0xff]  }
 0xfdd   :  { %v4154_v57 = vpop.f32.mrb[35].mxu0  ;;  %v4420_v55 = vld [vmem:[#allocation7 + $0x1c8] ss:$16 sps:$4 sm:$0xff]  }
 0xfde   :  { %v4428_v57 = vld [vmem:[#allocation7 + $0x1ec] ss:$16 sps:$4 sm:$0xff]   ;;  %3007 = vmatpush1.bf16.msra.mxu1 %v4417_v54 }
 0xfdf   :  { %3008 = vmatprep.subr.bf16.mxu1 %v4425_v56 }
 0xfe2   :  { %3009 = vmatpush1.bf16.msra.mxu1 %v4423_v59 }
0x100b   :  { %v2622_v39 = vpop.f32.mrb[44].mxu1 }
0x100c   :  { %2637 = vrot.lane.b32.xlu0 %v2622_v39, %s4710_s1  ;;  %v4159_v62 = vpop.f32.mrb[45].mxu1 }
0x100d   :  { %v2625_v1 = vpop.f32.mrb[46].mxu1 }
0x100e   :  { %v4160_v2 = vpop.f32.mrb[47].mxu1  ;;  %v2770_v1 = vrot.slane %v5156_v38, %v4903_v58 }
0x1049   :  { %v2630_v4 = vpop.permute.xlu0 %2629 }
0x104a   :  { %v2640_v6 = vsel %vm428_vm1, %v2484_v36, %v2630_v4  ;;  %v4404_v36 = vld [vmem:[#allocation7 + $0x16c] ss:$16 sps:$4 sm:$0xff]  }
0x104d   :  { %v2634_v5 = vpop.permute.xlu1 %2633 }
0x104e   :  { %v2641_v8 = vsel %vm976_vm4, %v2640_v6, %v2634_v5  ;;  %v2775_v5 = vrot.slane %v5156_v38, %v5004_v27 }
0x107e   :  { %v2638_v9 = vpop.permute.xlu0 %2637 }
0x107f   :  { %v2642_v10 = vsel %vm978_vm5, %v2641_v8, %v2638_v9 }
0x1080   :  { %v2645_v11 = vpack.c.bf16 %v2642_v10, %v2642_v10  ;;  %v4429_v10 = vld [vmem:[#allocation10 + $0x140] sm:$0xff]  }
0x1081   :  { %3960 = vmatprep.subr.bf16.mxu1 %v4429_v10 }
0x1082   :  { %4178 = vmatmul.mubr.bf16.vlgmr.msra.gmra.mrb[36].mxu0 %v2645_v11  ;;  %v4430_v11 = vld [vmem:[#allocation10 + $0x1c0] sm:$0xff]  }
0x1083   :  { %3067 = vmatprep.mubr.bf16.mxu0 %v4708_v25  ;;  %v4386_v25 = vld [vmem:[#allocation7 + $0x10c] ss:$16 sps:$4 sm:$0xff]  }
0x1084   :  { %3035 = vmatprep.subr.bf16.mxu0 %v4386_v25  ;;  %v4441_v25 = vld [vmem:[#allocation10 + $0x158] sm:$0xff]  }
0x1085   :  { %3036 = vmatpush1.bf16.msra.mxu0 %v4384_v21  ;;  %v4440_v21 = vld [vmem:[#allocation10 + $0x190] sm:$0xff]  }
0x1086   :  { %3037 = vmatprep.subr.bf16.mxu0 %v4392_v23  ;;  %v4443_v23 = vld [vmem:[#allocation10 + $0x118] sm:$0xff]  }
0x1089   :  { %3038 = vmatpush1.bf16.msra.mxu0 %v4390_v26  ;;  %v4445_v26 = vld [vmem:[#allocation10 + $0x160] sm:$0xff]  }
0x108a   :  { %3039 = vmatprep.subr.bf16.mxu0 %v4398_v29  ;;  %v4447_v29 = vld [vmem:[#allocation10 + $0x120] sm:$0xff]  }
0x1155   :  { %v2749_v13 = vpop.f32.mrb[36].mxu0 }
0x1156   :  { %v2750_v14 = vadd.f32 %v2749_v13, %v2666_v12  ;;  %v4179_v15 = vpop.f32.mrb[37].mxu0  ;;  %v4431_v12 = vld [vmem:[#allocation10 + $0x100] sm:$0xff]  }
0x1157   :  { %v2752_v16 = vpop.f32.mrb[38].mxu0  ;;  %v4432_v13 = vld [vmem:[#allocation10 + $0x180] sm:$0xff]   ;;  %v4434_v15 = vld [vmem:[#allocation10 + $0x1c8] sm:$0xff]  }
0x1158   :  { %v4180_v17 = vpop.f32.mrb[39].mxu0  ;;  %v2755_v18 = vadd.f32 %v2750_v14, %v5042_v7  ;;  %v4396_v7 = vld [vmem:[#allocation7 + $0x148] ss:$16 sps:$4 sm:$0xff]   ;;  %v4433_v14 = vld [vmem:[#allocation10 + $0x148] sm:$0xff]  }
0x1159   :  { %3040 = vmatpush1.bf16.msra.mxu0 %v4396_v7  ;;  %v4435_v16 = vld [vmem:[#allocation10 + $0x108] sm:$0xff]  }
0x115a   :  { %2756 = vadd.xlane.f32.xlu1 %v2755_v18  ;;  %3041 = vmatprep.subr.bf16.mxu0 %v4404_v36  ;;  %v4436_v17 = vld [vmem:[#allocation10 + $0x188] sm:$0xff]   ;;  %v4455_v36 = vld [vmem:[#allocation10 + $0x130] sm:$0xff]  }
0x115b   :  { %v4449_v7 = vld [vmem:[#allocation10 + $0x168] sm:$0xff]  }
0x115d   :  { %3042 = vmatpush1.bf16.msra.mxu0 %v4402_v40  ;;  %v4457_v40 = vld [vmem:[#allocation10 + $0x178] sm:$0xff]  }
0x115e   :  { %3043 = vmatprep.subr.bf16.mxu0 %v4410_v44  ;;  %v4459_v44 = vld [vmem:[#allocation10 + $0x138] sm:$0xff]  }
0x1161   :  { %3044 = vmatpush1.bf16.msra.mxu0 %v4408_v47  ;;  %v2812_v47 = vld [vmem:[#allocation8 + $0x4] sm:$0xf] }
0x1162   :  { %3045 = vmatprep.subr.bf16.mxu0 %v4416_v49  ;;  %v2817_v48 = vrot.slane %v2812_v47, %v4884_v43  ;;  %v2825_v49 = vrot.slane %v2812_v47, %v4903_v58  ;;  %v2821_v50 = vrot.slane %v2812_v47, %v4887_v45 }
0x1165   :  { %3046 = vmatpush1.bf16.msra.mxu0 %v4414_v51  ;;  %v2829_v51 = vrot.slane %v2812_v47, %v5004_v27 }
0x1166   :  { %3047 = vmatprep.subr.bf16.mxu0 %v4422_v53 }
0x1169   :  { %3048 = vmatpush1.bf16.msra.mxu0 %v4420_v55 }
0x116a   :  { %3049 = vmatprep.subr.bf16.mxu0 %v4428_v57 }
0x116d   :  { %3050 = vmatpush1.bf16.msra.mxu0 %v4426_v60 }
0x116e   :  { %3982 = vmatprep.subr.bf16.mxu0 %v4430_v11 }
0x11e7   :  { %v2757_v31 = vpop.xlane.xlu1 %2756 }
0x11e8   :  { %v2758_v32 = vmul.f32 0.0078125, %v2757_v31  ;;  %v4450_v31 = vld [vmem:[#allocation10 + $0x1e8] sm:$0xff]  }
0x11ea   :  { %v2759_v34 = vsub.f32 %v2755_v18, %v2758_v32  ;;  %v4437_v18 = vld [vmem:[#allocation10 + $0x150] sm:$0xff]   ;;  %v4451_v32 = vld [vmem:[#allocation10 + $0x128] sm:$0xff]  }
0x11ec   :  { %v2760_v35 = vmul.f32 %v2759_v34, %v2759_v34 }
0x11ee   :  { %2761 = vadd.xlane.f32.xlu0 %v2760_v35  ;;  %v4453_v35 = vld [vmem:[#allocation10 + $0x170] sm:$0xff]  }
0x127b   :  { %v2762_v61 = vpop.xlane.xlu0 %2761 }
0x127c   :  { %v2763_v39 = vmul.f32 0.0078125, %v2762_v61 }
0x127e   :  { %v2764_v62 = vadd.f32 1e-12, %v2763_v39 }
0x1280   :  { %4515 = vrsqrt.f32 %v2764_v62 }
0x128a   :  { %v4516_v2 = vpop.eup %4515 }
0x128b   :  { %v2766_v4 = vmul.f32 %v4516_v2, %v2759_v34  ;;  %v4452_v34 = vld [vmem:[#allocation10 + $0x1a8] sm:$0xff]  }
0x128d   :  { %v2771_v6 = vmul.f32 %v2770_v1, %v2766_v4 }
0x128f   :  { %v5165_v8 = vadd.f32 %v2775_v5, %v2771_v6 }
0x1291   :  { %v2777_v9 = vpack.c.bf16 %v5165_v8, %v5165_v8 }
0x1293   :  { %3027 = vmatmul.mubr.bf16.vlgmr.msra.gmra.mrb[48].mxu1 %v2777_v9  ;;  %3068 = vmatmul.mubr.bf16.vlgmr.msra.gmra.mrb[40].mxu0 %v2777_v9 }
0x1294   :  { %3961 = vmatpush3.bf16.msra.mxu1 %v4431_v12  ;;  %3983 = vmatpush3.bf16.msra.mxu0 %v4432_v13 }
0x1295   :  { %3962 = vmatprep.subr.bf16.mxu1 %v4433_v14  ;;  %3984 = vmatprep.subr.bf16.mxu0 %v4434_v15 }
0x1298   :  { %3963 = vmatpush3.bf16.msra.mxu1 %v4435_v16  ;;  %3985 = vmatpush3.bf16.msra.mxu0 %v4436_v17 }
0x1299   :  { %3964 = vmatprep.subr.bf16.mxu1 %v4437_v18  ;;  %3986 = vmatprep.subr.bf16.mxu0 %v4438_v19 }
0x129c   :  { %3965 = vmatpush3.bf16.msra.mxu1 %v4439_v20  ;;  %3987 = vmatpush3.bf16.msra.mxu0 %v4440_v21 }
0x129d   :  { %3966 = vmatprep.subr.bf16.mxu1 %v4441_v25  ;;  %3988 = vmatprep.subr.bf16.mxu0 %v4442_v22 }
0x12a0   :  { %3967 = vmatpush3.bf16.msra.mxu1 %v4443_v23  ;;  %3989 = vmatpush3.bf16.msra.mxu0 %v4444_v24 }
0x12a1   :  { %3968 = vmatprep.subr.bf16.mxu1 %v4445_v26  ;;  %3990 = vmatprep.subr.bf16.mxu0 %v4446_v28 }
0x12a4   :  { %3969 = vmatpush3.bf16.msra.mxu1 %v4447_v29  ;;  %3991 = vmatpush3.bf16.msra.mxu0 %v4448_v30 }
0x12a5   :  { %3970 = vmatprep.subr.bf16.mxu1 %v4449_v7  ;;  %3992 = vmatprep.subr.bf16.mxu0 %v4450_v31 }
0x12a8   :  { %3971 = vmatpush3.bf16.msra.mxu1 %v4451_v32  ;;  %3993 = vmatpush3.bf16.msra.mxu0 %v4452_v34 }
0x12a9   :  { %3972 = vmatprep.subr.bf16.mxu1 %v4453_v35  ;;  %3994 = vmatprep.subr.bf16.mxu0 %v4454_v33 }
0x12ac   :  { %3973 = vmatpush3.bf16.msra.mxu1 %v4455_v36  ;;  %3995 = vmatpush3.bf16.msra.mxu0 %v4456_v37 }
0x12ad   :  { %3974 = vmatprep.subr.bf16.mxu1 %v4457_v40  ;;  %3996 = vmatprep.subr.bf16.mxu0 %v4458_v41 }
0x12b0   :  { %3975 = vmatpush3.bf16.msra.mxu1 %v4459_v44  ;;  %3997 = vmatpush3.bf16.msra.mxu0 %v4460_v46 }
0x12b1   :  { %4181 = vmatprep.subr.bf16.mxu1 %v4707_v3 }
0x1366   :  { %v3028_v52 = vpop.f32.mrb[48].mxu1  ;;  %v3069_v53 = vpop.f32.mrb[40].mxu0 }
0x1367   :  { %v3029_v54 = vadd.f32 %v3028_v52, %v2817_v48  ;;  %v3070_v55 = vadd.f32 %v3069_v53, %v2825_v49  ;;  %v3030_v56 = vpop.f32.mrb[49].mxu1  ;;  %v3071_v57 = vpop.f32.mrb[41].mxu0  ;;  %v3184_v48 = vrot.slane %v5156_v38, %v4887_v45  ;;  %v4462_v45 = vld [vmem:[%s5237_s9 + $0x8] sm:$0xff]  }
0x1368   :  { %v3031_v59 = vadd.f32 %v3030_v56, %v2821_v50  ;;  %v3072_v60 = vadd.f32 %v3071_v57, %v2829_v51  ;;  %v3032_v61 = vpop.f32.mrb[50].mxu1  ;;  %v3073_v39 = vpop.f32.mrb[42].mxu0 }
0x1369   :  { %v3076_v62 = vmul.f32 %v3029_v54, %v3029_v54  ;;  %v3078_v1 = vmul.f32 %v3070_v55, %v3070_v55  ;;  %v3033_v2 = vpop.f32.mrb[51].mxu1  ;;  %v3074_v43 = vpop.f32.mrb[43].mxu0  ;;  %v4461_v39 = vld [vmem:[%s5237_s9] sm:$0xff]  }
0x136a   :  { %v3077_v4 = vmul.f32 %v3031_v59, %v3031_v59  ;;  %v3079_v58 = vmul.f32 %v3072_v60, %v3072_v60 }
0x136b   :  { %v3080_v5 = vmul.f32 %v3076_v62, %v3029_v54  ;;  %v3082_v6 = vmul.f32 %v3078_v1, %v3070_v55 }
0x136c   :  { %v3081_v9 = vmul.f32 %v3077_v4, %v3031_v59  ;;  %v3083_v27 = vmul.f32 %v3079_v58, %v3072_v60  ;;  %v4464_v4 = vld [vmem:[%s5237_s9 + $0x18] sm:$0xff]   ;;  %v4465_v58 = vld [vmem:[%s5237_s9 + $0x20] sm:$0xff]  }
0x136d   :  { %v3084_v10 = vmul.f32 0.044715, %v3080_v5  ;;  %v3086_v11 = vmul.f32 0.044715, %v3082_v6  ;;  %v4466_v5 = vld [vmem:[%s5237_s9 + $0x28] sm:$0xff]   ;;  %v4467_v6 = vld [vmem:[%s5237_s9 + $0x30] sm:$0xff]  }
0x136e   :  { %v3085_v12 = vmul.f32 0.044715, %v3081_v9  ;;  %v3087_v13 = vmul.f32 0.044715, %v3083_v27  ;;  %v4468_v9 = vld [vmem:[%s5237_s9 + $0x38] sm:$0xff]  }
0x136f   :  { %v3088_v14 = vadd.f32 %v3084_v10, %v3029_v54  ;;  %v3090_v15 = vadd.f32 %v3086_v11, %v3070_v55 }
0x1370   :  { %v3089_v16 = vadd.f32 %v3085_v12, %v3031_v59  ;;  %v3091_v17 = vadd.f32 %v3087_v13, %v3072_v60  ;;  %v3472_v12 = vrot.slane %v5156_v38, %v1803_v63 }
0x1371   :  { %v3092_v18 = vmul.f32 0.7978846, %v3088_v14  ;;  %v3094_v19 = vmul.f32 0.7978846, %v3090_v15  ;;  %v3477_v15 = vrot.slane %v5156_v38, %v1808_v0 }
0x1372   :  { %v3093_v20 = vmul.f32 0.7978846, %v3089_v16  ;;  %v3095_v21 = vmul.f32 0.7978846, %v3091_v17 }
0x1373   :  { %4517 = vtanh.f32 %v3092_v18 }
0x1374   :  { %4519 = vtanh.f32 %v3094_v19 }
0x1375   :  { %4521 = vtanh.f32 %v3093_v20 }
0x1376   :  { %4523 = vtanh.f32 %v3095_v21 }
0x137d   :  { %v4518_v25 = vpop.eup %4517 }
0x137e   :  { %v4520_v22 = vpop.eup %4519  ;;  %v3100_v23 = vadd.f32 1.0, %v4518_v25 }
0x137f   :  { %v4522_v24 = vpop.eup %4521  ;;  %v3102_v26 = vadd.f32 1.0, %v4520_v22 }
0x1380   :  { %v4524_v28 = vpop.eup %4523  ;;  %v3101_v29 = vadd.f32 1.0, %v4522_v24  ;;  %v3104_v30 = vmul.f32 0.5, %v3100_v23 }
0x1381   :  { %v3103_v7 = vadd.f32 1.0, %v4524_v28  ;;  %v3106_v31 = vmul.f32 0.5, %v3102_v26 }
0x1382   :  { %v3105_v32 = vmul.f32 0.5, %v3101_v29  ;;  %v3108_v35 = vmul.f32 %v3104_v30, %v3029_v54 }
0x1383   :  { %v3107_v34 = vmul.f32 0.5, %v3103_v7  ;;  %v3110_v36 = vmul.f32 %v3106_v31, %v3070_v55 }
0x1384   :  { %v3109_v33 = vmul.f32 %v3105_v32, %v3031_v59  ;;  %v3112_v44 = vpack.c.bf16 %v3108_v35, %v3108_v35 }
0x1385   :  { %v3111_v37 = vmul.f32 %v3107_v34, %v3072_v60  ;;  %v3114_v46 = vpack.c.bf16 %v3110_v36, %v3110_v36 }
0x1386   :  { %v3113_v40 = vpack.c.bf16 %v3109_v33, %v3109_v33 }
0x1387   :  { %v3115_v41 = vpack.c.bf16 %v3111_v37, %v3111_v37 }
0x1388   :  { %3409 = vmatprep.mubr.bf16.mxu1 %v3113_v40 }
0x1389   :  { %3449 = vmatprep.mubr.bf16.mxu0 %v3115_v41  ;;  %3410 = vmatmul.mubr.bf16.vlgmr.msra.gmra.mrb[52].mxu1 %v3112_v44 }
0x138a   :  { %3450 = vmatmul.mubr.bf16.vlgmr.msra.gmra.mrb[44].mxu0 %v3114_v46  ;;  %4197 = vmatprep.mubr.msk.bf16.mxu1 %vm4709_vm0, %v4707_v3 }
0x138b   :  { %4182 = vmatpush3.bf16.msra.mxu1 %v4461_v39 }
0x138c   :  { %4183 = vmatprep.subr.bf16.mxu1 %v4707_v3 }
0x138f   :  { %4184 = vmatpush3.bf16.msra.mxu1 %v4462_v45 }
0x1390   :  { %4185 = vmatprep.subr.bf16.mxu1 %v4707_v3 }
0x145c   :  { %v3976_v47 = vpop.f32.mrb[52].mxu1 }
0x145d   :  { %v3998_v49 = vpop.f32.mrb[44].mxu0  ;;  %v3977_v50 = vpop.f32.mrb[53].mxu1 }
0x145e   :  { %v3978_v51 = vadd.f32 %v3977_v50, %v3976_v47  ;;  %v3999_v52 = vpop.f32.mrb[45].mxu0  ;;  %v3979_v53 = vpop.f32.mrb[54].mxu1 }
0x145f   :  { %v4000_v54 = vadd.f32 %v3999_v52, %v3998_v49  ;;  %v4001_v55 = vpop.f32.mrb[46].mxu0  ;;  %v3980_v56 = vpop.f32.mrb[55].mxu1 }
0x1460   :  { %v3412_v57 = vadd.f32 %v3978_v51, %v3184_v48  ;;  %v4002_v59 = vpop.f32.mrb[47].mxu0 }
0x1462   :  { %v3452_v60 = vadd.f32 %v4000_v54, %v3412_v57 }
0x1464   :  { %v3457_v61 = vadd.f32 %v3452_v60, %v5165_v8  ;;  %v4463_v8 = vld [vmem:[%s5237_s9 + $0x10] sm:$0xff]   ;;  %s4712_s9 = smov [#allocation13]  }
0x1465   :  { %4186 = vmatpush3.bf16.msra.mxu1 %v4463_v8  ;;  %s3593_s19 = sshll.u32 %s4712_s9, 4  ;;  %s3594_s19 = int_to_ptr.vmem [resolvable:$true] %s3593_s19 }
0x1466   :  { %3458 = vadd.xlane.f32.xlu0 %v3457_v61  ;;  %4187 = vmatprep.subr.bf16.mxu1 %v4707_v3  ;;  %s4661_s22 = scalar_lea.vmem %s3594_s19, 16  ;;  %s4665_s23 = scalar_lea.vmem %s3594_s19, 32 }
0x1467   :  { %p4662_p6 = scmp.ne.s32.totalorder %s3594_s19, %s4661_s22  ;;  %p4666_p7 = scmp.lt.s32.totalorder %s3594_s19, %s3594_s19 }
0x1468   :  { %p4667_p8 = scmp.lt.s32.totalorder %s4665_s23, %s4661_s22 }
0x1469   :  { %4188 = vmatpush3.bf16.msra.mxu1 %v4464_v4 }
0x146a   :  { %4189 = vmatprep.subr.bf16.mxu1 %v4707_v3  ;;  %p4668_p9 = por %p4667_p8, %p4666_p7 }
0x146c   :  { %p4669_p10 = pnand %p4668_p9, %p4662_p6 }
0x146d   :  { %4190 = vmatpush3.bf16.msra.mxu1 %v4465_v58 }
0x146e   :  { %4191 = vmatprep.subr.bf16.mxu1 %v4707_v3 }
0x1471   :  { %4192 = vmatpush3.bf16.msra.mxu1 %v4466_v5 }
0x1472   :  { %4193 = vmatprep.subr.bf16.mxu1 %v4707_v3 }
0x1475   :  { %4194 = vmatpush3.bf16.msra.mxu1 %v4467_v6 }
0x1476   :  { %4195 = vmatprep.subr.bf16.mxu1 %v4707_v3  ;;  %v3496_v3 = vld [vmem:[#allocation11] sm:$0x1] }
0x1479   :  { %4196 = vmatpush3.bf16.msra.mxu1 %v4468_v9 }
0x14f3   :  { %v3459_v62 = vpop.xlane.xlu0 %3458 }
0x14f4   :  { %v3460_v1 = vmul.f32 0.0078125, %v3459_v62 }
0x14f6   :  { %v3461_v2 = vsub.f32 %v3457_v61, %v3460_v1 }
0x14f8   :  { %v3462_v43 = vmul.f32 %v3461_v2, %v3461_v2 }
0x14fa   :  { %3463 = vadd.xlane.f32.xlu1 %v3462_v43 }
0x1587   :  { %v3464_v27 = vpop.xlane.xlu1 %3463 }
0x1588   :  { %v3465_v10 = vmul.f32 0.0078125, %v3464_v27 }
0x158a   :  { %v3466_v11 = vadd.f32 1e-12, %v3465_v10 }
0x158c   :  { %4525 = vrsqrt.f32 %v3466_v11 }
0x1596   :  { %v4526_v13 = vpop.eup %4525 }
0x1597   :  { %v3468_v14 = vmul.f32 %v4526_v13, %v3461_v2 }
0x1599   :  { %v3473_v16 = vmul.f32 %v3472_v12, %v3468_v14 }
0x159b   :  { %v3478_v17 = vadd.f32 %v3477_v15, %v3473_v16 }
0x159d   :  { %v3479_v18 = vpack.c.bf16 %v3478_v17, %v3478_v17 }
0x159f   :  { %4198 = vmatmul.mubr.bf16.vlgmr.msra.gmra.mrb[56].mxu1 %v3479_v18 }
0x1672   :  { %v3579_v19 = vpop.f32.mrb[56].mxu1 }
0x1673   :  { %v3580_v20 = vadd.f32 %v3579_v19, %v3496_v3  ;;  %v4199_v21 = vpop.f32.mrb[57].mxu1 }
0x1674   :  { %v3582_v25 = vpop.f32.mrb[58].mxu1 }
0x1675   :  { %4527 = vtanh.f32 %v3580_v20  ;;  %v4200_v22 = vpop.f32.mrb[59].mxu1 }
0x167f   :  { %v4528_v63 = vpop.eup %4527 }
0x1680   :  { %3586 = vst [vmem:[#allocation13] sm:$0x1] %v4528_v63 }
0x1681   :  { %4672 = shalt.err (!%p4669_p10)
}
0x1682   :  { %s4673_s20 = scalar_lea.hbm %s5239_s11, 16 }
0x1683   :  { %p4674_p11 = scmp.ne.s32.totalorder %s5239_s11, %s4673_s20  ;;  %p4677_p12 = scmp.lt.u32.totalorder %s4673_s20, %s5239_s11 }
0x1685   :  { %p4679_p13 = pnand %p4677_p12, %p4674_p11 }
0x1687   :  { %4682 = shalt.err (!%p4679_p13)
}
0x1688   :  { %3596 = dma.vmem_to_hbm [thread:$0]  %s3594_s19, 16, %s5239_s11, [#allocation4]  }
0x1689   :  { %4691 = dma.done.wait [#allocation4], 16  }
0x168a   :  { %4692 = vsyncadd [#allocation4], 4294967280 }
0x168b   :  { %3600 = vsyncpa [#allocation3], 1 }
0x168c   :  { %3601 = vsyncpa [#allocation6], 1 }
0x168d   :  { %3602 = vsyncpa [#allocation9], 1 }
0x168e   :  { %3603 = vsyncpa [#allocation12], 1 }
0x168f   :  { %3604 = vsyncpa [#allocation4], 1 }

</bundles_post_ra>
